<compile_context>
chip_gen: v7x
topology: tpu7x:2x2x1
jax: 0.10.0
libtpu: 0.0.40
codegen_flags: <defaults>
</compile_context>

<pallas_src>
import jax
import jax.numpy as jnp
from jax.experimental import pallas as pl
from jax.experimental.pallas import tpu as pltpu


LANE = 128      # lane width (last dim)
SUBLANE = 8     # f32 sublane height (second-to-last dim)


def _round_up(n, m):
    return (n + m - 1) // m * m


# ----------------------------- fused Pallas kernel ---------------------------

def _decoder_step_kernel(tok_ref, emb_ref, h_ref, c_ref, w_ref, b_ref,
                         fcw_ref, fcb_ref,
                         pred_ref, h_out_ref, c_out_ref):
    """One full decoder step.

    tok_ref : (Bp, 1)  int32  padded token ids
    emb_ref : (Vp, D)  f32    padded embedding table
    h_ref   : (L, Bp, D) f32  padded hidden state
    c_ref   : (L, Bp, D) f32  padded cell state
    w_ref   : (L, 2D, 4D) f32 per-layer combined [W_ih^T ; W_hh^T], gate-blocked
    b_ref   : (L, 1, 4D) f32  per-layer (b_ih + b_hh), gate-blocked
    fcw_ref : (D, Op) f32     fc.weight^T (padded)
    fcb_ref : (1, Op) f32     fc.bias (padded)
    Gate order (PyTorch): i, f, g, o; each gate block is D lanes wide.
    """
    L, Bp, D = h_ref.shape
    Vp = emb_ref.shape[0]

    # ---- embedding gather as a lane-dense one-hot matmul (MXU) ----
    ids = tok_ref[...]                                           # (Bp, 1) int32
    vocab_iota = jax.lax.broadcasted_iota(jnp.int32, (Bp, Vp), 1)
    onehot = (vocab_iota == ids).astype(jnp.float32)             # (Bp, Vp)
    x = jnp.dot(onehot, emb_ref[...],
                preferred_element_type=jnp.float32)              # (Bp, D)

    # ---- multi-layer LSTM, single time step (loop statically unrolled) ----
    for layer in range(L):
        h_prev = h_ref[layer]                                    # (Bp, D)
        c_prev = c_ref[layer]                                    # (Bp, D)
        xh = jnp.concatenate([x, h_prev], axis=1)                # (Bp, 2D)
        gates = (jnp.dot(xh, w_ref[layer],
                         preferred_element_type=jnp.float32)
                 + b_ref[layer])                                 # (Bp, 4D)

        i_g = jax.nn.sigmoid(gates[:, 0 * D:1 * D])
        f_g = jax.nn.sigmoid(gates[:, 1 * D:2 * D])
        g_g = jnp.tanh(gates[:, 2 * D:3 * D])
        o_g = jax.nn.sigmoid(gates[:, 3 * D:4 * D])

        c_new = f_g * c_prev + i_g * g_g
        h_new = o_g * jnp.tanh(c_new)

        h_out_ref[layer] = h_new
        c_out_ref[layer] = c_new
        x = h_new                                                # eval-mode dropout = id

    # ---- final vocab projection ----
    pred_ref[...] = (jnp.dot(x, fcw_ref[...],
                             preferred_element_type=jnp.float32)
                     + fcb_ref[...])


# ------------------------- parameter init & packing --------------------------

def init_decoder_params(key, output_dim, embed_dim, hidden_dim, num_layers):
    """Deterministic synthetic parameters in PyTorch nn.LSTM / nn.Linear layout."""
    H2 = 2 * hidden_dim  # LSTM hidden size is 2*hidden_dim in the module
    keys = jax.random.split(key, 4 + 4 * num_layers)
    kit = iter(keys)

    def rnd(k, shape):
        return (0.1 * jax.random.normal(k, shape)).astype(jnp.float32)

    params = {
        "embedding": rnd(next(kit), (output_dim, embed_dim)),  # embed_matrix copy
        "fc_w_t": rnd(next(kit), (H2, output_dim)),            # fc.weight^T
        "fc_b": rnd(next(kit), (1, output_dim)),               # fc.bias
        "layers": [],
    }
    for layer in range(num_layers):
        in_dim = embed_dim if layer == 0 else H2
        w_ih_t = rnd(next(kit), (in_dim, 4 * H2))  # weight_ih_l{k}^T
        w_hh_t = rnd(next(kit), (H2, 4 * H2))      # weight_hh_l{k}^T
        b_ih = rnd(next(kit), (1, 4 * H2))
        b_hh = rnd(next(kit), (1, 4 * H2))
        params["layers"].append(
            {"w_ih_t": w_ih_t, "w_hh_t": w_hh_t, "b": b_ih + b_hh})
    return params


def pack_decoder_params(raw):
    """One-time packing of raw params into the lane/sublane-aligned,
    gate-blocked layout the fused kernel consumes (zero padding => exact math
    in the valid region)."""
    emb = raw["embedding"]
    V, E = emb.shape
    H2 = raw["layers"][0]["w_hh_t"].shape[0]
    O = raw["fc_w_t"].shape[1]
    L = len(raw["layers"])

    D = _round_up(max(E, H2), LANE)    # shared padded width for x and h
    Vp = _round_up(V, LANE)            # padded vocab (one-hot lane width)
    Op = _round_up(O, LANE)            # padded output width

    emb_p = jnp.zeros((Vp, D), jnp.float32).at[:V, :E].set(emb)

    w_p = jnp.zeros((L, 2 * D, 4 * D), jnp.float32)
    b_p = jnp.zeros((L, 1, 4 * D), jnp.float32)
    for l, lp in enumerate(raw["layers"]):
        w_ih_t, w_hh_t, bias = lp["w_ih_t"], lp["w_hh_t"], lp["b"]
        in_dim = w_ih_t.shape[0]
        for g in range(4):  # gate-blocked columns: each gate gets its own D lanes
            w_p = w_p.at[l, :in_dim, g * D:g * D + H2].set(
                w_ih_t[:, g * H2:(g + 1) * H2])
            w_p = w_p.at[l, D:D + H2, g * D:g * D + H2].set(
                w_hh_t[:, g * H2:(g + 1) * H2])
            b_p = b_p.at[l, :, g * D:g * D + H2].set(
                bias[:, g * H2:(g + 1) * H2])

    fcw_p = jnp.zeros((D, Op), jnp.float32).at[:H2, :O].set(raw["fc_w_t"])
    fcb_p = jnp.zeros((1, Op), jnp.float32).at[:, :O].set(raw["fc_b"])

    return {
        "emb": emb_p, "w": w_p, "b": b_p, "fc_w": fcw_p, "fc_b": fcb_p,
        "dims": dict(V=V, E=E, H2=H2, O=O, L=L, D=D, Vp=Vp, Op=Op),
    }


# ------------------------------- forward pass --------------------------------

def decoder_forward(packed, token_ids, hidden, cell):
    """Mirrors Decoder.forward (eval mode: dropout = identity).

    token_ids: (B,) int32
    hidden, cell: (num_layers, B, 2*hidden_dim)
    returns: prediction (B, 1, output_dim), new hidden, new cell
    """
    d = packed["dims"]
    L, D, Op, H2, O = d["L"], d["D"], d["Op"], d["H2"], d["O"]
    B = token_ids.shape[0]
    Bp = _round_up(B, SUBLANE)

    tok_p = jnp.zeros((Bp, 1), jnp.int32).at[:B, 0].set(
        token_ids.astype(jnp.int32))
    h_p = jnp.zeros((L, Bp, D), jnp.float32).at[:, :B, :H2].set(hidden)
    c_p = jnp.zeros((L, Bp, D), jnp.float32).at[:, :B, :H2].set(cell)

    vmem = pl.BlockSpec(memory_space=pltpu.MemorySpace.VMEM)
    pred_p, h_out_p, c_out_p = pl.pallas_call(
        _decoder_step_kernel,
        out_shape=(jax.ShapeDtypeStruct((Bp, Op), jnp.float32),
                   jax.ShapeDtypeStruct((L, Bp, D), jnp.float32),
                   jax.ShapeDtypeStruct((L, Bp, D), jnp.float32)),
        in_specs=[vmem] * 8,
        out_specs=(vmem, vmem, vmem),
    )(tok_p, packed["emb"], h_p, c_p, packed["w"], packed["b"],
      packed["fc_w"], packed["fc_b"])

    prediction = pred_p[:B, :O][:, None, :]      # (B, 1, output_dim)
    hidden_new = h_out_p[:, :B, :H2]
    cell_new = c_out_p[:, :B, :H2]
    return prediction, hidden_new, cell_new


# ------------------------- pure-JAX reference check --------------------------

def _ref_forward(params, token_ids, hidden, cell):
    x = jnp.take(params["embedding"], token_ids, axis=0)
    new_h, new_c = [], []
    for layer_idx, lp in enumerate(params["layers"]):
        H = hidden.shape[-1]
        gates = x @ lp["w_ih_t"] + hidden[layer_idx] @ lp["w_hh_t"] + lp["b"]
        i_g = jax.nn.sigmoid(gates[:, 0 * H:1 * H])
        f_g = jax.nn.sigmoid(gates[:, 1 * H:2 * H])
        g_g = jnp.tanh(gates[:, 2 * H:3 * H])
        o_g = jax.nn.sigmoid(gates[:, 3 * H:4 * H])
        c_l = f_g * cell[layer_idx] + i_g * g_g
        h_l = o_g * jnp.tanh(c_l)
        new_h.append(h_l)
        new_c.append(c_l)
        x = h_l
    pred = x @ params["fc_w_t"] + params["fc_b"]
    return pred[:, None, :], jnp.stack(new_h), jnp.stack(new_c)


# ---------------------------------- main -------------------------------------

if __name__ == "__main__":
    OUTPUT_DIM = 32   # vocab size
    EMBED_DIM = 16
    HIDDEN_DIM = 16   # LSTM hidden size = 2*HIDDEN_DIM = 32
    NUM_LAYERS = 2
    BATCH = 2
    H2 = 2 * HIDDEN_DIM

    key = jax.random.PRNGKey(0)
    k_par, k_tok, k_h, k_c = jax.random.split(key, 4)

    raw_params = init_decoder_params(k_par, OUTPUT_DIM, EMBED_DIM, HIDDEN_DIM,
                                     NUM_LAYERS)
    packed_params = pack_decoder_params(raw_params)

    token_ids = jax.random.randint(k_tok, (BATCH,), 0, OUTPUT_DIM,
                                   dtype=jnp.int32)
    hidden0 = (0.1 * jax.random.normal(k_h, (NUM_LAYERS, BATCH, H2))
               ).astype(jnp.float32)
    cell0 = (0.1 * jax.random.normal(k_c, (NUM_LAYERS, BATCH, H2))
             ).astype(jnp.float32)

    # single compiled step (packed weights closed over -> baked as constants)
    fwd = jax.jit(lambda tok, h, c: decoder_forward(packed_params, tok, h, c))

    pred, hidden1, cell1 = fwd(token_ids, hidden0, cell0)
    pred = jax.block_until_ready(pred)
    hidden1 = jax.block_until_ready(hidden1)
    cell1 = jax.block_until_ready(cell1)

    assert pred.shape == (BATCH, 1, OUTPUT_DIM)
    assert hidden1.shape == (NUM_LAYERS, BATCH, H2)
    assert cell1.shape == (NUM_LAYERS, BATCH, H2)

    # correctness vs. pure-JAX reference of the same math (f32 everywhere)
    ref_pred, ref_h, ref_c = _ref_forward(raw_params, token_ids, hidden0, cell0)
    assert jnp.allclose(pred, ref_pred, atol=1e-5, rtol=1e-5)
    assert jnp.allclose(hidden1, ref_h, atol=1e-5, rtol=1e-5)
    assert jnp.allclose(cell1, ref_c, atol=1e-5, rtol=1e-5)

    print("KERNEL_OK")
</pallas_src>

<mosaic_0001>
module attributes {stable_mosaic.version = 11 : i64} {
  func.func @_decoder_step_kernel(%arg0: memref<8x1xi32, #tpu.memory_space<vmem>>, %arg1: memref<128x128xf32, #tpu.memory_space<vmem>>, %arg2: memref<2x8x128xf32, #tpu.memory_space<vmem>>, %arg3: memref<2x8x128xf32, #tpu.memory_space<vmem>>, %arg4: memref<2x256x512xf32, #tpu.memory_space<vmem>>, %arg5: memref<2x1x512xf32, #tpu.memory_space<vmem>>, %arg6: memref<128x128xf32, #tpu.memory_space<vmem>>, %arg7: memref<1x128xf32, #tpu.memory_space<vmem>>, %arg8: memref<8x128xf32, #tpu.memory_space<vmem>>, %arg9: memref<2x8x128xf32, #tpu.memory_space<vmem>>, %arg10: memref<2x8x128xf32, #tpu.memory_space<vmem>>) attributes {dimension_semantics = [], scalar_prefetch = 0 : i64, scratch_operands = 0 : i64, tpu.core_type = #tpu.core_type<tc>} {
    %c0 = arith.constant 0 : index
    %c0_0 = arith.constant 0 : index
    %0 = vector.load %arg0[%c0, %c0_0] : memref<8x1xi32, #tpu.memory_space<vmem>>, vector<8x1xi32>
    %1 = tpu.iota {dimensions = array<i32: 1>} : vector<8x128xi32>
    %2 = vector.broadcast %0 : vector<8x1xi32> to vector<8x128xi32>
    %3 = arith.cmpi eq, %1, %2 : vector<8x128xi32>
    %4 = arith.extui %3 : vector<8x128xi1> to vector<8x128xi32>
    %5 = arith.sitofp %4 : vector<8x128xi32> to vector<8x128xf32>
    %c0_1 = arith.constant 0 : index
    %c0_2 = arith.constant 0 : index
    %6 = vector.load %arg1[%c0_1, %c0_2] : memref<128x128xf32, #tpu.memory_space<vmem>>, vector<128x128xf32>
    %cst = arith.constant dense<0.000000e+00> : vector<8x128xf32>
    %7 = tpu.matmul %5, %6, %cst {dimension_numbers = #tpu.dot_dimension_numbers<[1], [0], [0], [1], [0, 0, 1, 1], [], []>} : vector<8x128xf32>, vector<128x128xf32>, vector<8x128xf32> -> vector<8x128xf32>
    %c0_3 = arith.constant 0 : index
    %c0_4 = arith.constant 0 : index
    %c0_5 = arith.constant 0 : index
    %8 = vector.load %arg2[%c0_3, %c0_4, %c0_5] : memref<2x8x128xf32, #tpu.memory_space<vmem>>, vector<1x8x128xf32>
    %9 = vector.shape_cast %8 : vector<1x8x128xf32> to vector<8x128xf32>
    %c0_6 = arith.constant 0 : index
    %c0_7 = arith.constant 0 : index
    %c0_8 = arith.constant 0 : index
    %10 = vector.load %arg3[%c0_6, %c0_7, %c0_8] : memref<2x8x128xf32, #tpu.memory_space<vmem>>, vector<1x8x128xf32>
    %11 = vector.shape_cast %10 : vector<1x8x128xf32> to vector<8x128xf32>
    %12 = tpu.concatenate %7, %9 in 1 : vector<8x128xf32>, vector<8x128xf32> -> vector<8x256xf32>
    %c0_9 = arith.constant 0 : index
    %c0_10 = arith.constant 0 : index
    %c0_11 = arith.constant 0 : index
    %13 = vector.load %arg4[%c0_9, %c0_10, %c0_11] : memref<2x256x512xf32, #tpu.memory_space<vmem>>, vector<1x256x512xf32>
    %14 = vector.shape_cast %13 : vector<1x256x512xf32> to vector<256x512xf32>
    %cst_12 = arith.constant dense<0.000000e+00> : vector<8x512xf32>
    %15 = tpu.matmul %12, %14, %cst_12 {dimension_numbers = #tpu.dot_dimension_numbers<[1], [0], [0], [1], [0, 0, 1, 1], [], []>} : vector<8x256xf32>, vector<256x512xf32>, vector<8x512xf32> -> vector<8x512xf32>
    %c0_13 = arith.constant 0 : index
    %c0_14 = arith.constant 0 : index
    %c0_15 = arith.constant 0 : index
    %16 = vector.load %arg5[%c0_13, %c0_14, %c0_15] : memref<2x1x512xf32, #tpu.memory_space<vmem>>, vector<1x1x512xf32>
    %17 = vector.shape_cast %16 : vector<1x1x512xf32> to vector<1x512xf32>
    %18 = vector.broadcast %17 : vector<1x512xf32> to vector<8x512xf32>
    %19 = arith.addf %15, %18 : vector<8x512xf32>
    %20 = vector.extract_strided_slice %19 {offsets = [0, 0], sizes = [8, 128], strides = [1, 1]} : vector<8x512xf32> to vector<8x128xf32>
    %21 = arith.negf %20 : vector<8x128xf32>
    %22 = math.exp %21 : vector<8x128xf32>
    %cst_16 = arith.constant 1.000000e+00 : f32
    %23 = vector.broadcast %cst_16 : f32 to vector<8x128xf32>
    %24 = arith.addf %23, %22 : vector<8x128xf32>
    %25 = arith.divf %23, %24 : vector<8x128xf32>
    %26 = vector.extract_strided_slice %19 {offsets = [0, 128], sizes = [8, 128], strides = [1, 1]} : vector<8x512xf32> to vector<8x128xf32>
    %27 = arith.negf %26 : vector<8x128xf32>
    %28 = math.exp %27 : vector<8x128xf32>
    %cst_17 = arith.constant 1.000000e+00 : f32
    %29 = vector.broadcast %cst_17 : f32 to vector<8x128xf32>
    %30 = arith.addf %29, %28 : vector<8x128xf32>
    %31 = arith.divf %29, %30 : vector<8x128xf32>
    %32 = vector.extract_strided_slice %19 {offsets = [0, 256], sizes = [8, 128], strides = [1, 1]} : vector<8x512xf32> to vector<8x128xf32>
    %33 = math.tanh %32 : vector<8x128xf32>
    %34 = vector.extract_strided_slice %19 {offsets = [0, 384], sizes = [8, 128], strides = [1, 1]} : vector<8x512xf32> to vector<8x128xf32>
    %35 = arith.negf %34 : vector<8x128xf32>
    %36 = math.exp %35 : vector<8x128xf32>
    %cst_18 = arith.constant 1.000000e+00 : f32
    %37 = vector.broadcast %cst_18 : f32 to vector<8x128xf32>
    %38 = arith.addf %37, %36 : vector<8x128xf32>
    %39 = arith.divf %37, %38 : vector<8x128xf32>
    %40 = arith.mulf %31, %11 : vector<8x128xf32>
    %41 = arith.mulf %25, %33 : vector<8x128xf32>
    %42 = arith.addf %40, %41 : vector<8x128xf32>
    %43 = math.tanh %42 : vector<8x128xf32>
    %44 = arith.mulf %39, %43 : vector<8x128xf32>
    %c0_19 = arith.constant 0 : index
    %c0_20 = arith.constant 0 : index
    %c0_21 = arith.constant 0 : index
    %45 = vector.load %arg9[%c0_19, %c0_20, %c0_21] : memref<2x8x128xf32, #tpu.memory_space<vmem>>, vector<1x8x128xf32>
    %46 = vector.shape_cast %45 : vector<1x8x128xf32> to vector<8x128xf32>
    %47 = vector.shape_cast %44 : vector<8x128xf32> to vector<1x8x128xf32>
    tpu.vector_store %arg9[%c0_19, %c0_20, %c0_21], %47 {strides = array<i32>} : memref<2x8x128xf32, #tpu.memory_space<vmem>>, vector<1x8x128xf32>,
    %c0_22 = arith.constant 0 : index
    %c0_23 = arith.constant 0 : index
    %c0_24 = arith.constant 0 : index
    %48 = vector.load %arg10[%c0_22, %c0_23, %c0_24] : memref<2x8x128xf32, #tpu.memory_space<vmem>>, vector<1x8x128xf32>
    %49 = vector.shape_cast %48 : vector<1x8x128xf32> to vector<8x128xf32>
    %50 = vector.shape_cast %42 : vector<8x128xf32> to vector<1x8x128xf32>
    tpu.vector_store %arg10[%c0_22, %c0_23, %c0_24], %50 {strides = array<i32>} : memref<2x8x128xf32, #tpu.memory_space<vmem>>, vector<1x8x128xf32>,
    %c1 = arith.constant 1 : index
    %c0_25 = arith.constant 0 : index
    %c0_26 = arith.constant 0 : index
    %51 = vector.load %arg2[%c1, %c0_25, %c0_26] : memref<2x8x128xf32, #tpu.memory_space<vmem>>, vector<1x8x128xf32>
    %52 = vector.shape_cast %51 : vector<1x8x128xf32> to vector<8x128xf32>
    %c1_27 = arith.constant 1 : index
    %c0_28 = arith.constant 0 : index
    %c0_29 = arith.constant 0 : index
    %53 = vector.load %arg3[%c1_27, %c0_28, %c0_29] : memref<2x8x128xf32, #tpu.memory_space<vmem>>, vector<1x8x128xf32>
    %54 = vector.shape_cast %53 : vector<1x8x128xf32> to vector<8x128xf32>
    %55 = tpu.concatenate %44, %52 in 1 : vector<8x128xf32>, vector<8x128xf32> -> vector<8x256xf32>
    %c1_30 = arith.constant 1 : index
    %c0_31 = arith.constant 0 : index
    %c0_32 = arith.constant 0 : index
    %56 = vector.load %arg4[%c1_30, %c0_31, %c0_32] : memref<2x256x512xf32, #tpu.memory_space<vmem>>, vector<1x256x512xf32>
    %57 = vector.shape_cast %56 : vector<1x256x512xf32> to vector<256x512xf32>
    %cst_33 = arith.constant dense<0.000000e+00> : vector<8x512xf32>
    %58 = tpu.matmul %55, %57, %cst_33 {dimension_numbers = #tpu.dot_dimension_numbers<[1], [0], [0], [1], [0, 0, 1, 1], [], []>} : vector<8x256xf32>, vector<256x512xf32>, vector<8x512xf32> -> vector<8x512xf32>
    %c1_34 = arith.constant 1 : index
    %c0_35 = arith.constant 0 : index
    %c0_36 = arith.constant 0 : index
    %59 = vector.load %arg5[%c1_34, %c0_35, %c0_36] : memref<2x1x512xf32, #tpu.memory_space<vmem>>, vector<1x1x512xf32>
    %60 = vector.shape_cast %59 : vector<1x1x512xf32> to vector<1x512xf32>
    %61 = vector.broadcast %60 : vector<1x512xf32> to vector<8x512xf32>
    %62 = arith.addf %58, %61 : vector<8x512xf32>
    %63 = vector.extract_strided_slice %62 {offsets = [0, 0], sizes = [8, 128], strides = [1, 1]} : vector<8x512xf32> to vector<8x128xf32>
    %64 = arith.negf %63 : vector<8x128xf32>
    %65 = math.exp %64 : vector<8x128xf32>
    %cst_37 = arith.constant 1.000000e+00 : f32
    %66 = vector.broadcast %cst_37 : f32 to vector<8x128xf32>
    %67 = arith.addf %66, %65 : vector<8x128xf32>
    %68 = arith.divf %66, %67 : vector<8x128xf32>
    %69 = vector.extract_strided_slice %62 {offsets = [0, 128], sizes = [8, 128], strides = [1, 1]} : vector<8x512xf32> to vector<8x128xf32>
    %70 = arith.negf %69 : vector<8x128xf32>
    %71 = math.exp %70 : vector<8x128xf32>
    %cst_38 = arith.constant 1.000000e+00 : f32
    %72 = vector.broadcast %cst_38 : f32 to vector<8x128xf32>
    %73 = arith.addf %72, %71 : vector<8x128xf32>
    %74 = arith.divf %72, %73 : vector<8x128xf32>
    %75 = vector.extract_strided_slice %62 {offsets = [0, 256], sizes = [8, 128], strides = [1, 1]} : vector<8x512xf32> to vector<8x128xf32>
    %76 = math.tanh %75 : vector<8x128xf32>
    %77 = vector.extract_strided_slice %62 {offsets = [0, 384], sizes = [8, 128], strides = [1, 1]} : vector<8x512xf32> to vector<8x128xf32>
    %78 = arith.negf %77 : vector<8x128xf32>
    %79 = math.exp %78 : vector<8x128xf32>
    %cst_39 = arith.constant 1.000000e+00 : f32
    %80 = vector.broadcast %cst_39 : f32 to vector<8x128xf32>
    %81 = arith.addf %80, %79 : vector<8x128xf32>
    %82 = arith.divf %80, %81 : vector<8x128xf32>
    %83 = arith.mulf %74, %54 : vector<8x128xf32>
    %84 = arith.mulf %68, %76 : vector<8x128xf32>
    %85 = arith.addf %83, %84 : vector<8x128xf32>
    %86 = math.tanh %85 : vector<8x128xf32>
    %87 = arith.mulf %82, %86 : vector<8x128xf32>
    %c1_40 = arith.constant 1 : index
    %c0_41 = arith.constant 0 : index
    %c0_42 = arith.constant 0 : index
    %88 = vector.load %arg9[%c1_40, %c0_41, %c0_42] : memref<2x8x128xf32, #tpu.memory_space<vmem>>, vector<1x8x128xf32>
    %89 = vector.shape_cast %88 : vector<1x8x128xf32> to vector<8x128xf32>
    %90 = vector.shape_cast %87 : vector<8x128xf32> to vector<1x8x128xf32>
    tpu.vector_store %arg9[%c1_40, %c0_41, %c0_42], %90 {strides = array<i32>} : memref<2x8x128xf32, #tpu.memory_space<vmem>>, vector<1x8x128xf32>,
    %c1_43 = arith.constant 1 : index
    %c0_44 = arith.constant 0 : index
    %c0_45 = arith.constant 0 : index
    %91 = vector.load %arg10[%c1_43, %c0_44, %c0_45] : memref<2x8x128xf32, #tpu.memory_space<vmem>>, vector<1x8x128xf32>
    %92 = vector.shape_cast %91 : vector<1x8x128xf32> to vector<8x128xf32>
    %93 = vector.shape_cast %85 : vector<8x128xf32> to vector<1x8x128xf32>
    tpu.vector_store %arg10[%c1_43, %c0_44, %c0_45], %93 {strides = array<i32>} : memref<2x8x128xf32, #tpu.memory_space<vmem>>, vector<1x8x128xf32>,
    %c0_46 = arith.constant 0 : index
    %c0_47 = arith.constant 0 : index
    %94 = vector.load %arg6[%c0_46, %c0_47] : memref<128x128xf32, #tpu.memory_space<vmem>>, vector<128x128xf32>
    %cst_48 = arith.constant dense<0.000000e+00> : vector<8x128xf32>
    %95 = tpu.matmul %87, %94, %cst_48 {dimension_numbers = #tpu.dot_dimension_numbers<[1], [0], [0], [1], [0, 0, 1, 1], [], []>} : vector<8x128xf32>, vector<128x128xf32>, vector<8x128xf32> -> vector<8x128xf32>
    %c0_49 = arith.constant 0 : index
    %c0_50 = arith.constant 0 : index
    %96 = vector.load %arg7[%c0_49, %c0_50] : memref<1x128xf32, #tpu.memory_space<vmem>>, vector<1x128xf32>
    %97 = vector.broadcast %96 : vector<1x128xf32> to vector<8x128xf32>
    %98 = arith.addf %95, %97 : vector<8x128xf32>
    %c0_51 = arith.constant 0 : index
    %c0_52 = arith.constant 0 : index
    %99 = vector.load %arg8[%c0_51, %c0_52] : memref<8x128xf32, #tpu.memory_space<vmem>>, vector<8x128xf32>
    tpu.vector_store %arg8[%c0_51, %c0_52], %98 {strides = array<i32>} : memref<8x128xf32, #tpu.memory_space<vmem>>, vector<8x128xf32>,
    return
  }
}

</mosaic_0001>

<bundles_post_ra>
// kernel: _lambda_.1
= control target key start
LH: loop header
LB: loop body
LE: loop exit
PB: predicated region body
PF: predicated region fallthrough
CT: control target
= control target key end

     0   :  { %16 = vsyncpa [#allocation3], 0  ;;  %s1645_s0 = inlined_call_operand.vmem [shape: s32[8,1], index: 0, kind: input, shape index: {}]   ;;  %s1646_s1 = inlined_call_operand.hbm [shape: f32[128,128], index: 1, kind: input, shape index: {}]   ;;  %s1647_s2 = inlined_call_operand.vmem [shape: f32[2,8,128], index: 2, kind: input, shape index: {}]   ;;  %s1648_s3 = inlined_call_operand.vmem [shape: f32[2,8,128], index: 3, kind: input, shape index: {}]   ;;  %s1649_s4 = inlined_call_operand.hbm [shape: f32[2,256,512], index: 4, kind: input, shape index: {}]   ;;  %s1650_s5 = inlined_call_operand.vmem [shape: f32[2,1,512], index: 5, kind: input, shape index: {}]   ;;  %s1651_s6 = inlined_call_operand.hbm [shape: f32[128,128], index: 6, kind: input, shape index: {}]   ;;  %s1652_s7 = inlined_call_operand.vmem [shape: f32[1,128], index: 7, kind: input, shape index: {}]   ;;  %s1653_s8 = inlined_call_operand.vmem [shape: f32[8,128], index: 8, kind: output, shape index: {0}]   ;;  %s1654_s9 = inlined_call_operand.vmem [shape: f32[2,8,128], index: 9, kind: output, shape index: {1}]   ;;  %s1655_s10 = inlined_call_operand.vmem [shape: f32[2,8,128], index: 10, kind: output, shape index: {2}]  }
   0x1   :  { %17 = vsyncpa [#allocation5], 0  ;;  %s1459_s13 = smov [#allocation4]   ;;  %s1389_s17 = scalar_lea.hbm %s1649_s4, 32768 }
   0x2   :  { %s41_s14 = sshll.u32 %s1459_s13, 4  ;;  %p1390_p0 = scmp.ne.s32.totalorder %s1649_s4, %s1389_s17  ;;  %s42_s14 = int_to_ptr.vmem [resolvable:$true] %s41_s14 }
   0x3   :  { %p1393_p1 = scmp.lt.u32.totalorder %s1389_s17, %s1649_s4 }
   0x5   :  { %p1395_p2 = pnand %p1393_p1, %p1390_p0 }
   0x7   :  { %1398 = shalt.err (!%p1395_p2)
}
   0x8   :  { %s1399_s22 = scalar_lea.vmem %s42_s14, 32768  ;;  %p1404_p4 = scmp.lt.s32.totalorder %s42_s14, %s42_s14 }
   0x9   :  { %p1400_p3 = scmp.ne.s32.totalorder %s42_s14, %s1399_s22  ;;  %p1405_p5 = scmp.lt.s32.totalorder %s1399_s22, %s1399_s22 }
   0xb   :  { %p1406_p6 = por %p1405_p5, %p1404_p4 }
   0xd   :  { %p1407_p7 = pnand %p1406_p6, %p1400_p3 }
   0xf   :  { %1410 = shalt.err (!%p1407_p7)
}
  0x10   :  { %s1460_s23 = smov 512   ;;  %s1461_s24 = smov 32  }
  0x11   :  { %47 = dma.hbm_to_vmem [thread:$0]  %s1649_s4, 32768, %s42_s14, [#allocation5], %s1460_s23, %s1460_s23, %s1461_s24  }
  0x12   :  { %s1462_s27 = smov [#allocation2]   ;;  %s1411_s11 = scalar_lea.hbm %s1646_s1, 2048 }
  0x13   :  { %s25_s28 = sshll.u32 %s1462_s27, 4  ;;  %p1412_p8 = scmp.ne.s32.totalorder %s1646_s1, %s1411_s11  ;;  %s26_s28 = int_to_ptr.vmem [resolvable:$true] %s25_s28 }
  0x14   :  { %p1415_p9 = scmp.lt.u32.totalorder %s1411_s11, %s1646_s1 }
  0x16   :  { %p1417_p10 = pnand %p1415_p9, %p1412_p8 }
  0x18   :  { %1420 = shalt.err (!%p1417_p10)
}
  0x19   :  { %s1421_s17 = scalar_lea.vmem %s26_s28, 2048  ;;  %p1426_p12 = scmp.lt.s32.totalorder %s26_s28, %s26_s28 }
  0x1a   :  { %p1422_p11 = scmp.ne.s32.totalorder %s26_s28, %s1421_s17  ;;  %p1427_p13 = scmp.lt.s32.totalorder %s1421_s17, %s1421_s17 }
  0x1c   :  { %p1428_p0 = por %p1427_p13, %p1426_p12 }
  0x1e   :  { %p1429_p1 = pnand %p1428_p0, %p1422_p11 }
  0x20   :  { %1432 = shalt.err (!%p1429_p1)
}
  0x21   :  { %s1463_s4 = smov 128   ;;  %s1464_s14 = smov 8  }
  0x22   :  { %31 = dma.hbm_to_vmem [thread:$0]  %s1646_s1, 2048, %s26_s28, [#allocation3], %s1463_s4, %s1463_s4, %s1464_s14  }
  0x23   :  { %s1465_s20 = smov [#allocation6]   ;;  %s1433_s24 = scalar_lea.hbm %s1651_s6, 2048 }
  0x24   :  { %s55_s21 = sshll.u32 %s1465_s20, 4  ;;  %p1434_p2 = scmp.ne.s32.totalorder %s1651_s6, %s1433_s24  ;;  %s56_s21 = int_to_ptr.vmem [resolvable:$true] %s55_s21 }
  0x25   :  { %p1437_p3 = scmp.lt.u32.totalorder %s1433_s24, %s1651_s6 }
  0x27   :  { %p1439_p4 = pnand %p1437_p3, %p1434_p2 }
  0x29   :  { %1442 = shalt.err (!%p1439_p4)
}
  0x2a   :  { %s1443_s30 = scalar_lea.vmem %s56_s21, 2048  ;;  %p1448_p6 = scmp.lt.s32.totalorder %s56_s21, %s56_s21 }
  0x2b   :  { %p1444_p5 = scmp.ne.s32.totalorder %s56_s21, %s1443_s30  ;;  %p1449_p7 = scmp.lt.s32.totalorder %s1443_s30, %s1443_s30 }
  0x2d   :  { %p1450_p8 = por %p1449_p7, %p1448_p6 }
  0x2f   :  { %p1451_p9 = pnand %p1450_p8, %p1444_p5 }
  0x31   :  { %1454 = shalt.err (!%p1451_p9)
}
  0x32   :  { %61 = dma.hbm_to_vmem [thread:$0]  %s1651_s6, 2048, %s56_s21, [#allocation5], %s1463_s4, %s1463_s4, %s1464_s14  }
  0x33   :  { %1455 = dma.done.wait [#allocation3], 2048  }
  0x34   :  { %1456 = vsyncadd [#allocation3], 4294965248 }
  0x35   :  { %1457 = dma.done.wait [#allocation5], 34816  }
  0x36   :  { %1458 = vsyncadd [#allocation5], 4294932480  ;;  %v1466_v0 = vmov 0   ;;  %v1467_v1 = vmov 0.0|0.0   ;;  %v73_v2 = vld [vmem:[%s1645_s0] sm:$0xff]  ;;  %v83_v4 = vld [vmem:[#allocation2 + $0x8] sm:$0xff] }
  0x37   :  { %1356 = vset.pattern.permute.xlu0 %v1466_v0  ;;  %1040 = vmatprep.subr.bf16.mxu0 %v1467_v1  ;;  %v82_v3 = vld [vmem:[#allocation2] sm:$0xff]  ;;  %v84_v6 = vld [vmem:[#allocation2 + $0x10] sm:$0xff]  ;;  %v85_v7 = vld [vmem:[#allocation2 + $0x18] sm:$0xff]  ;;  %vm1468_vm0 = vmmov 0   ;;  %v1469_v8 = vmov 0.0  }
  0x38   :  { %77 = vperm.xlu0 %1356, %v73_v2   ;;  %v1041_v5 = vpack.c.bf16 %v83_v4, %v82_v3  ;;  %1002 = vmatprep.mubr.msk.f32.mxu0 %vm1468_vm0, %v1469_v8  ;;  %v1044_v9 = vpack.c.bf16 %v85_v7, %v84_v6  ;;  %v86_v10 = vld [vmem:[#allocation2 + $0x20] sm:$0xff]  ;;  %v87_v11 = vld [vmem:[#allocation2 + $0x28] sm:$0xff]  ;;  %v88_v15 = vld [vmem:[#allocation2 + $0x30] sm:$0xff] }
  0x39   :  { %v171_v12 = vld [vmem:[#allocation4 + $0x8] sm:$0xff]  ;;  %v1047_v14 = vpack.c.bf16 %v87_v11, %v86_v10  ;;  %v170_v17 = vld [vmem:[#allocation4] sm:$0xff]  ;;  %v89_v19 = vld [vmem:[#allocation2 + $0x38] sm:$0xff] }
  0x3a   :  { %1042 = vmatpush3.bf16.msra.mxu0 %v1041_v5  ;;  %v175_v13 = vld [vmem:[#allocation4 + $0x28] sm:$0xff]  ;;  %v174_v18 = vld [vmem:[#allocation4 + $0x20] sm:$0xff]  ;;  %v1050_v26 = vpack.c.bf16 %v89_v19, %v88_v15  ;;  %v92_v39 = vld [vmem:[#allocation2 + $0x50] sm:$0xff] }
  0x3b   :  { %1043 = vmatprep.subr.bf16.mxu0 %v1467_v1  ;;  %v1064_v16 = vpack.c.bf16 %v175_v13, %v171_v12  ;;  %v1066_v20 = vpack.c.bf16 %v174_v18, %v170_v17  ;;  %v179_v21 = vld [vmem:[#allocation4 + $0x48] sm:$0xff]  ;;  %v178_v24 = vld [vmem:[#allocation4 + $0x40] sm:$0xff]  ;;  %v93_v43 = vld [vmem:[#allocation2 + $0x58] sm:$0xff] }
  0x3c   :  { %v183_v22 = vld [vmem:[#allocation4 + $0x68] sm:$0xff]  ;;  %v182_v25 = vld [vmem:[#allocation4 + $0x60] sm:$0xff]  ;;  %v1056_v47 = vpack.c.bf16 %v93_v43, %v92_v39  ;;  %v96_v57 = vld [vmem:[#allocation2 + $0x70] sm:$0xff] }
  0x3d   :  { %1065 = vmatprep.subr.bf16.mxu1 %v1064_v16  ;;  %v1068_v23 = vpack.c.bf16 %v183_v22, %v179_v21  ;;  %v90_v27 = vld [vmem:[#allocation2 + $0x40] sm:$0xff]  ;;  %v1070_v28 = vpack.c.bf16 %v182_v25, %v178_v24  ;;  %v187_v29 = vld [vmem:[#allocation4 + $0x88] sm:$0xff]  ;;  %v97_v61 = vld [vmem:[#allocation2 + $0x78] sm:$0xff] }
  0x3e   :  { %1045 = vmatpush3.bf16.msra.mxu0 %v1044_v9  ;;  %1067 = vmatpush1.bf16.msra.mxu1 %v1066_v20  ;;  %v191_v30 = vld [vmem:[#allocation4 + $0xa8] sm:$0xff]  ;;  %v186_v33 = vld [vmem:[#allocation4 + $0x80] sm:$0xff]  ;;  %v173_v0 = vld [vmem:[#allocation4 + $0x18] sm:$0xff]  ;;  %v1062_v4 = vpack.c.bf16 %v97_v61, %v96_v57 }
  0x3f   :  { %1046 = vmatprep.subr.bf16.mxu0 %v1467_v1  ;;  %1069 = vmatprep.subr.bf16.mxu1 %v1068_v23  ;;  %v91_v31 = vld [vmem:[#allocation2 + $0x48] sm:$0xff]  ;;  %v1072_v32 = vpack.c.bf16 %v191_v30, %v187_v29  ;;  %v190_v34 = vld [vmem:[#allocation4 + $0xa0] sm:$0xff]  ;;  %v177_v2 = vld [vmem:[#allocation4 + $0x38] sm:$0xff] }
  0x40   :  { %v195_v35 = vld [vmem:[#allocation4 + $0xc8] sm:$0xff]  ;;  %v1074_v36 = vpack.c.bf16 %v190_v34, %v186_v33  ;;  %v1053_v38 = vpack.c.bf16 %v91_v31, %v90_v27  ;;  %v194_v41 = vld [vmem:[#allocation4 + $0xc0] sm:$0xff]  ;;  %v1128_v9 = vpack.c.bf16 %v177_v2, %v173_v0  ;;  %v74_v2 = vlaneseq }
  0x41   :  { %v199_v37 = vld [vmem:[#allocation4 + $0xe8] sm:$0xff]  ;;  %v198_v42 = vld [vmem:[#allocation4 + $0xe0] sm:$0xff] }
  0x42   :  { %1048 = vmatpush3.bf16.msra.mxu0 %v1047_v14  ;;  %1071 = vmatpush1.bf16.msra.mxu1 %v1070_v28  ;;  %v1076_v40 = vpack.c.bf16 %v199_v37, %v195_v35  ;;  %v203_v44 = vld [vmem:[#allocation4 + $0x108] sm:$0xff]  ;;  %v1078_v46 = vpack.c.bf16 %v198_v42, %v194_v41  ;;  %v94_v48 = vld [vmem:[#allocation2 + $0x60] sm:$0xff] }
  0x43   :  { %1049 = vmatprep.subr.bf16.mxu0 %v1467_v1  ;;  %1073 = vmatprep.subr.bf16.mxu1 %v1072_v32  ;;  %v207_v45 = vld [vmem:[#allocation4 + $0x128] sm:$0xff]  ;;  %v202_v50 = vld [vmem:[#allocation4 + $0x100] sm:$0xff] }
  0x44   :  { %v1080_v49 = vpack.c.bf16 %v207_v45, %v203_v44  ;;  %v206_v51 = vld [vmem:[#allocation4 + $0x120] sm:$0xff]  ;;  %v95_v52 = vld [vmem:[#allocation2 + $0x68] sm:$0xff] }
  0x45   :  { %v211_v53 = vld [vmem:[#allocation4 + $0x148] sm:$0xff]  ;;  %v1082_v55 = vpack.c.bf16 %v206_v51, %v202_v50  ;;  %v1059_v56 = vpack.c.bf16 %v95_v52, %v94_v48  ;;  %v210_v59 = vld [vmem:[#allocation4 + $0x140] sm:$0xff] }
  0x46   :  { %1051 = vmatpush3.bf16.msra.mxu0 %v1050_v26  ;;  %1075 = vmatpush1.bf16.msra.mxu1 %v1074_v36  ;;  %v215_v54 = vld [vmem:[#allocation4 + $0x168] sm:$0xff]  ;;  %v214_v60 = vld [vmem:[#allocation4 + $0x160] sm:$0xff] }
  0x47   :  { %1052 = vmatprep.subr.bf16.mxu0 %v1467_v1  ;;  %1077 = vmatprep.subr.bf16.mxu1 %v1076_v40  ;;  %v1084_v58 = vpack.c.bf16 %v215_v54, %v211_v53  ;;  %v219_v62 = vld [vmem:[#allocation4 + $0x188] sm:$0xff]  ;;  %v1086_v3 = vpack.c.bf16 %v214_v60, %v210_v59  ;;  %v218_v6 = vld [vmem:[#allocation4 + $0x180] sm:$0xff] }
  0x48   :  { %v223_v63 = vld [vmem:[#allocation4 + $0x1a8] sm:$0xff]  ;;  %v222_v7 = vld [vmem:[#allocation4 + $0x1a0] sm:$0xff] }
  0x49   :  { %v1088_v5 = vpack.c.bf16 %v223_v63, %v219_v62  ;;  %v227_v10 = vld [vmem:[#allocation4 + $0x1c8] sm:$0xff]  ;;  %v1090_v12 = vpack.c.bf16 %v222_v7, %v218_v6  ;;  %v226_v14 = vld [vmem:[#allocation4 + $0x1c0] sm:$0xff]  ;;  %v181_v6 = vld [vmem:[#allocation4 + $0x58] sm:$0xff] }
  0x4a   :  { %1054 = vmatpush3.bf16.msra.mxu0 %v1053_v38  ;;  %1079 = vmatpush1.bf16.msra.mxu1 %v1078_v46  ;;  %v231_v11 = vld [vmem:[#allocation4 + $0x1e8] sm:$0xff]  ;;  %v230_v15 = vld [vmem:[#allocation4 + $0x1e0] sm:$0xff]  ;;  %v185_v7 = vld [vmem:[#allocation4 + $0x78] sm:$0xff] }
  0x4b   :  { %1055 = vmatprep.subr.bf16.mxu0 %v1467_v1  ;;  %1081 = vmatprep.subr.bf16.mxu1 %v1080_v49  ;;  %v1092_v13 = vpack.c.bf16 %v231_v11, %v227_v10  ;;  %v235_v16 = vld [vmem:[#allocation4 + $0x208] sm:$0xff]  ;;  %v1094_v18 = vpack.c.bf16 %v230_v15, %v226_v14  ;;  %v234_v20 = vld [vmem:[#allocation4 + $0x200] sm:$0xff]  ;;  %v1132_v11 = vpack.c.bf16 %v185_v7, %v181_v6  ;;  %v189_v14 = vld [vmem:[#allocation4 + $0x98] sm:$0xff] }
  0x4c   :  { %v239_v17 = vld [vmem:[#allocation4 + $0x228] sm:$0xff]  ;;  %v238_v21 = vld [vmem:[#allocation4 + $0x220] sm:$0xff]  ;;  %v193_v15 = vld [vmem:[#allocation4 + $0xb8] sm:$0xff] }
  0x4d   :  { %v1096_v19 = vpack.c.bf16 %v239_v17, %v235_v16  ;;  %v243_v22 = vld [vmem:[#allocation4 + $0x248] sm:$0xff]  ;;  %v1098_v24 = vpack.c.bf16 %v238_v21, %v234_v20  ;;  %v242_v26 = vld [vmem:[#allocation4 + $0x240] sm:$0xff]  ;;  %v1470_v16 = vmov 1.0   ;;  %v192_v20 = vld [vmem:[#allocation4 + $0xb0] sm:$0xff] }
  0x4e   :  { %1057 = vmatpush3.bf16.msra.mxu0 %v1056_v47  ;;  %1083 = vmatpush1.bf16.msra.mxu1 %v1082_v55  ;;  %v247_v23 = vld [vmem:[#allocation4 + $0x268] sm:$0xff]  ;;  %v246_v27 = vld [vmem:[#allocation4 + $0x260] sm:$0xff]  ;;  %v197_v21 = vld [vmem:[#allocation4 + $0xd8] sm:$0xff] }
  0x4f   :  { %1058 = vmatprep.subr.bf16.mxu0 %v1467_v1  ;;  %1085 = vmatprep.subr.bf16.mxu1 %v1084_v58  ;;  %v1100_v25 = vpack.c.bf16 %v247_v23, %v243_v22  ;;  %v251_v28 = vld [vmem:[#allocation4 + $0x288] sm:$0xff]  ;;  %v1102_v30 = vpack.c.bf16 %v246_v27, %v242_v26  ;;  %v250_v32 = vld [vmem:[#allocation4 + $0x280] sm:$0xff]  ;;  %v201_v22 = vld [vmem:[#allocation4 + $0xf8] sm:$0xff] }
  0x50   :  { %v255_v29 = vld [vmem:[#allocation4 + $0x2a8] sm:$0xff]  ;;  %v254_v33 = vld [vmem:[#allocation4 + $0x2a0] sm:$0xff]  ;;  %v200_v26 = vld [vmem:[#allocation4 + $0xf0] sm:$0xff] }
  0x51   :  { %v1104_v31 = vpack.c.bf16 %v255_v29, %v251_v28  ;;  %v259_v34 = vld [vmem:[#allocation4 + $0x2c8] sm:$0xff]  ;;  %v1106_v36 = vpack.c.bf16 %v254_v33, %v250_v32  ;;  %v258_v38 = vld [vmem:[#allocation4 + $0x2c0] sm:$0xff]  ;;  %v205_v27 = vld [vmem:[#allocation4 + $0x118] sm:$0xff] }
  0x52   :  { %1060 = vmatpush3.bf16.msra.mxu0 %v1059_v56  ;;  %1087 = vmatpush1.bf16.msra.mxu1 %v1086_v3  ;;  %v263_v35 = vld [vmem:[#allocation4 + $0x2e8] sm:$0xff]  ;;  %v262_v39 = vld [vmem:[#allocation4 + $0x2e0] sm:$0xff]  ;;  %v172_v3 = vld [vmem:[#allocation4 + $0x10] sm:$0xff] }
  0x53   :  { %1061 = vmatprep.subr.bf16.mxu0 %v1467_v1  ;;  %1089 = vmatprep.subr.bf16.mxu1 %v1088_v5  ;;  %v1108_v37 = vpack.c.bf16 %v263_v35, %v259_v34  ;;  %v267_v40 = vld [vmem:[#allocation4 + $0x308] sm:$0xff]  ;;  %v1110_v42 = vpack.c.bf16 %v262_v39, %v258_v38  ;;  %v266_v44 = vld [vmem:[#allocation4 + $0x300] sm:$0xff]  ;;  %v75_v5 = vand.u32 127, %v74_v2  ;;  %v209_v28 = vld [vmem:[#allocation4 + $0x138] sm:$0xff] }
  0x54   :  { %v271_v41 = vld [vmem:[#allocation4 + $0x328] sm:$0xff]  ;;  %v270_v45 = vld [vmem:[#allocation4 + $0x320] sm:$0xff]  ;;  %v208_v32 = vld [vmem:[#allocation4 + $0x130] sm:$0xff] }
  0x55   :  { %v1112_v43 = vpack.c.bf16 %v271_v41, %v267_v40  ;;  %v275_v46 = vld [vmem:[#allocation4 + $0x348] sm:$0xff]  ;;  %v1114_v48 = vpack.c.bf16 %v270_v45, %v266_v44  ;;  %v274_v50 = vld [vmem:[#allocation4 + $0x340] sm:$0xff]  ;;  %v213_v33 = vld [vmem:[#allocation4 + $0x158] sm:$0xff] }
  0x56   :  { %1063 = vmatpush3.bf16.msra.mxu0 %v1062_v4  ;;  %1091 = vmatpush1.bf16.msra.mxu1 %v1090_v12  ;;  %v279_v47 = vld [vmem:[#allocation4 + $0x368] sm:$0xff]  ;;  %v278_v51 = vld [vmem:[#allocation4 + $0x360] sm:$0xff]  ;;  %v176_v4 = vld [vmem:[#allocation4 + $0x30] sm:$0xff] }
  0x57   :  { %1129 = vmatprep.subr.bf16.mxu0 %v1128_v9  ;;  %1093 = vmatprep.subr.bf16.mxu1 %v1092_v13  ;;  %v1116_v49 = vpack.c.bf16 %v279_v47, %v275_v46  ;;  %v283_v52 = vld [vmem:[#allocation4 + $0x388] sm:$0xff]  ;;  %v1118_v54 = vpack.c.bf16 %v278_v51, %v274_v50  ;;  %v282_v56 = vld [vmem:[#allocation4 + $0x380] sm:$0xff]  ;;  %v1130_v9 = vpack.c.bf16 %v176_v4, %v172_v3  ;;  %v180_v12 = vld [vmem:[#allocation4 + $0x50] sm:$0xff] }
  0x58   :  { %v287_v53 = vld [vmem:[#allocation4 + $0x3a8] sm:$0xff]  ;;  %v286_v57 = vld [vmem:[#allocation4 + $0x3a0] sm:$0xff]  ;;  %v184_v13 = vld [vmem:[#allocation4 + $0x70] sm:$0xff] }
  0x59   :  { %v1120_v55 = vpack.c.bf16 %v287_v53, %v283_v52  ;;  %v291_v58 = vld [vmem:[#allocation4 + $0x3c8] sm:$0xff]  ;;  %v1122_v60 = vpack.c.bf16 %v286_v57, %v282_v56  ;;  %v290_v62 = vld [vmem:[#allocation4 + $0x3c0] sm:$0xff]  ;;  %v1134_v17 = vpack.c.bf16 %v184_v13, %v180_v12  ;;  %v217_v34 = vld [vmem:[#allocation4 + $0x178] sm:$0xff] }
  0x5a   :  { %1095 = vmatpush1.bf16.msra.mxu1 %v1094_v18  ;;  %v295_v59 = vld [vmem:[#allocation4 + $0x3e8] sm:$0xff]  ;;  %v294_v63 = vld [vmem:[#allocation4 + $0x3e0] sm:$0xff]  ;;  %v1136_v18 = vpack.c.bf16 %v193_v15, %v189_v14  ;;  %v216_v38 = vld [vmem:[#allocation4 + $0x170] sm:$0xff] }
  0x5b   :  { %1097 = vmatprep.subr.bf16.mxu1 %v1096_v19  ;;  %v1124_v61 = vpack.c.bf16 %v295_v59, %v291_v58  ;;  %v1126_v0 = vpack.c.bf16 %v294_v63, %v290_v62  ;;  %v188_v19 = vld [vmem:[#allocation4 + $0x90] sm:$0xff]  ;;  %v221_v39 = vld [vmem:[#allocation4 + $0x198] sm:$0xff] }
  0x5c   :  { %v1138_v23 = vpack.c.bf16 %v192_v20, %v188_v19  ;;  %v225_v40 = vld [vmem:[#allocation4 + $0x1b8] sm:$0xff]  ;;  %v224_v44 = vld [vmem:[#allocation4 + $0x1b0] sm:$0xff] }
  0x5d   :  { %v229_v45 = vld [vmem:[#allocation4 + $0x1d8] sm:$0xff]  ;;  %v232_v50 = vld [vmem:[#allocation4 + $0x1f0] sm:$0xff] }
  0x5e   :  { %1099 = vmatpush1.bf16.msra.mxu1 %v1098_v24  ;;  %v1140_v24 = vpack.c.bf16 %v201_v22, %v197_v21  ;;  %v233_v46 = vld [vmem:[#allocation4 + $0x1f8] sm:$0xff]  ;;  %v240_v56 = vld [vmem:[#allocation4 + $0x230] sm:$0xff] }
  0x5f   :  { %1101 = vmatprep.subr.bf16.mxu1 %v1100_v25  ;;  %v196_v25 = vld [vmem:[#allocation4 + $0xd0] sm:$0xff]  ;;  %v237_v51 = vld [vmem:[#allocation4 + $0x218] sm:$0xff] }
  0x60   :  { %v1142_v29 = vpack.c.bf16 %v200_v26, %v196_v25  ;;  %v241_v52 = vld [vmem:[#allocation4 + $0x238] sm:$0xff]  ;;  %v248_v62 = vld [vmem:[#allocation4 + $0x270] sm:$0xff] }
  0x61   :  { %v245_v57 = vld [vmem:[#allocation4 + $0x258] sm:$0xff]  ;;  %v256_v6 = vld [vmem:[#allocation4 + $0x2b0] sm:$0xff] }
  0x62   :  { %1103 = vmatpush1.bf16.msra.mxu1 %v1102_v30  ;;  %v1144_v30 = vpack.c.bf16 %v209_v28, %v205_v27  ;;  %v249_v58 = vld [vmem:[#allocation4 + $0x278] sm:$0xff]  ;;  %v260_v12 = vld [vmem:[#allocation4 + $0x2d0] sm:$0xff] }
  0x63   :  { %1105 = vmatprep.subr.bf16.mxu1 %v1104_v31  ;;  %v204_v31 = vld [vmem:[#allocation4 + $0x110] sm:$0xff]  ;;  %v253_v63 = vld [vmem:[#allocation4 + $0x298] sm:$0xff] }
  0x64   :  { %v1146_v35 = vpack.c.bf16 %v208_v32, %v204_v31  ;;  %v261_v7 = vld [vmem:[#allocation4 + $0x2d8] sm:$0xff]  ;;  %v264_v13 = vld [vmem:[#allocation4 + $0x2f0] sm:$0xff] }
  0x65   :  { %v269_v14 = vld [vmem:[#allocation4 + $0x318] sm:$0xff]  ;;  %v272_v19 = vld [vmem:[#allocation4 + $0x330] sm:$0xff] }
  0x66   :  { %1107 = vmatpush1.bf16.msra.mxu1 %v1106_v36  ;;  %v1148_v36 = vpack.c.bf16 %v217_v34, %v213_v33  ;;  %v273_v15 = vld [vmem:[#allocation4 + $0x338] sm:$0xff]  ;;  %v280_v25 = vld [vmem:[#allocation4 + $0x370] sm:$0xff] }
  0x67   :  { %1109 = vmatprep.subr.bf16.mxu1 %v1108_v37  ;;  %v212_v37 = vld [vmem:[#allocation4 + $0x150] sm:$0xff]  ;;  %v277_v20 = vld [vmem:[#allocation4 + $0x358] sm:$0xff] }
  0x68   :  { %v1150_v41 = vpack.c.bf16 %v216_v38, %v212_v37  ;;  %v281_v21 = vld [vmem:[#allocation4 + $0x378] sm:$0xff]  ;;  %v288_v31 = vld [vmem:[#allocation4 + $0x3b0] sm:$0xff] }
  0x69   :  { %v285_v26 = vld [vmem:[#allocation4 + $0x398] sm:$0xff]  ;;  %v296_v37 = vld [vmem:[#allocation4 + $0x3f0] sm:$0xff] }
  0x6a   :  { %1111 = vmatpush1.bf16.msra.mxu1 %v1110_v42  ;;  %v1152_v42 = vpack.c.bf16 %v225_v40, %v221_v39  ;;  %v289_v27 = vld [vmem:[#allocation4 + $0x3b8] sm:$0xff]  ;;  %v168_v39 = vld [vmem:[%s1647_s2] sm:$0xff]  ;;  %v494_v40 = vld [vmem:[#allocation4 + $0x408] sm:$0xff] }
  0x6b   :  { %1113 = vmatprep.subr.bf16.mxu1 %v1112_v43  ;;  %v220_v43 = vld [vmem:[#allocation4 + $0x190] sm:$0xff]  ;;  %v293_v32 = vld [vmem:[#allocation4 + $0x3d8] sm:$0xff]  ;;  %384 = vmatprep.mubr.f32.mxu1 %v168_v39 }
  0x6c   :  { %v1154_v47 = vpack.c.bf16 %v224_v44, %v220_v43  ;;  %v297_v33 = vld [vmem:[#allocation4 + $0x3f8] sm:$0xff] }
  0x6d   :  { %v500_v44 = vld [vmem:[#allocation4 + $0x438] sm:$0xff] }
  0x6e   :  { %1115 = vmatpush1.bf16.msra.mxu1 %v1114_v48  ;;  %v1156_v48 = vpack.c.bf16 %v233_v46, %v229_v45  ;;  %v493_v46 = vld [vmem:[#allocation4 + $0x400] sm:$0xff] }
  0x6f   :  { %1117 = vmatprep.subr.bf16.mxu1 %v1116_v49  ;;  %v228_v49 = vld [vmem:[#allocation4 + $0x1d0] sm:$0xff] }
  0x70   :  { %v1158_v53 = vpack.c.bf16 %v232_v50, %v228_v49  ;;  %v499_v49 = vld [vmem:[#allocation4 + $0x430] sm:$0xff]  ;;  %v502_v50 = vld [vmem:[#allocation4 + $0x448] sm:$0xff] }
  0x72   :  { %1119 = vmatpush1.bf16.msra.mxu1 %v1118_v54  ;;  %v1160_v54 = vpack.c.bf16 %v241_v52, %v237_v51  ;;  %v506_v51 = vld [vmem:[#allocation4 + $0x468] sm:$0xff]  ;;  %v504_v52 = vld [vmem:[#allocation4 + $0x458] sm:$0xff] }
  0x73   :  { %1121 = vmatprep.subr.bf16.mxu1 %v1120_v55  ;;  %v236_v55 = vld [vmem:[#allocation4 + $0x210] sm:$0xff] }
  0x74   :  { %v1162_v59 = vpack.c.bf16 %v240_v56, %v236_v55  ;;  %v501_v56 = vld [vmem:[#allocation4 + $0x440] sm:$0xff] }
  0x76   :  { %1123 = vmatpush1.bf16.msra.mxu1 %v1122_v60  ;;  %v1164_v60 = vpack.c.bf16 %v249_v58, %v245_v57  ;;  %v505_v57 = vld [vmem:[#allocation4 + $0x460] sm:$0xff]  ;;  %v1196_v58 = vpack.c.bf16 %v506_v51, %v502_v50  ;;  %v535_v50 = vld [vmem:[#allocation4 + $0x550] sm:$0xff] }
  0x77   :  { %1125 = vmatprep.subr.bf16.mxu1 %v1124_v61  ;;  %v244_v61 = vld [vmem:[#allocation4 + $0x250] sm:$0xff] }
  0x78   :  { %v1166_v3 = vpack.c.bf16 %v248_v62, %v244_v61  ;;  %v507_v61 = vld [vmem:[#allocation4 + $0x470] sm:$0xff]  ;;  %v510_v62 = vld [vmem:[#allocation4 + $0x488] sm:$0xff] }
  0x79   :  { %v539_v51 = vld [vmem:[#allocation4 + $0x570] sm:$0xff] }
  0x7a   :  { %1127 = vmatpush1.bf16.msra.mxu1 %v1126_v0  ;;  %v257_v0 = vld [vmem:[#allocation4 + $0x2b8] sm:$0xff] }
  0x7b   :  { %v1168_v4 = vpack.c.bf16 %v257_v0, %v253_v63  ;;  %v514_v0 = vld [vmem:[#allocation4 + $0x4a8] sm:$0xff] }
  0xb7   :  { %v78_v10 = vpop.permute.xlu0 %77 }
  0xb8   :  { %vm79_vm1 = vcmp.eq.s32.totalorder %v75_v5, %v78_v10  ;;  %v252_v5 = vld [vmem:[#allocation4 + $0x290] sm:$0xff] }
  0xb9   :  { %1003 = vmatmul.mubr.msk.f32.vlgmr.msra.gmra.mrb[0].mxu0 %vm79_vm1, %v1470_v16  ;;  %v1170_v10 = vpack.c.bf16 %v256_v6, %v252_v5  ;;  %v1174_v16 = vpack.c.bf16 %v264_v13, %v260_v12  ;;  %v1198_v6 = vpack.c.bf16 %v505_v57, %v501_v56  ;;  %v511_v13 = vld [vmem:[#allocation4 + $0x490] sm:$0xff]  ;;  %v548_v57 = vld [vmem:[#allocation4 + $0x5b8] sm:$0xff] }
  0xba   :  { %1131 = vmatpush1.bf16.msra.mxu0 %v1130_v9  ;;  %v265_v9 = vld [vmem:[#allocation4 + $0x2f8] sm:$0xff]  ;;  %455 = vmatprep.mubr.f32.mxu0 %v168_v39  ;;  %v531_v39 = vld [vmem:[#allocation4 + $0x530] sm:$0xff] }
  0xbb   :  { %1133 = vmatprep.subr.bf16.mxu0 %v1132_v11  ;;  %v1172_v11 = vpack.c.bf16 %v265_v9, %v261_v7  ;;  %v509_v9 = vld [vmem:[#allocation4 + $0x480] sm:$0xff] }
  0xbe   :  { %1135 = vmatpush1.bf16.msra.mxu0 %v1134_v17  ;;  %v1176_v17 = vpack.c.bf16 %v273_v15, %v269_v14  ;;  %v515_v14 = vld [vmem:[#allocation4 + $0x4b0] sm:$0xff]  ;;  %v518_v15 = vld [vmem:[#allocation4 + $0x4c8] sm:$0xff] }
  0xbf   :  { %1137 = vmatprep.subr.bf16.mxu0 %v1136_v18  ;;  %v268_v18 = vld [vmem:[#allocation4 + $0x310] sm:$0xff] }
  0xc0   :  { %v1178_v22 = vpack.c.bf16 %v272_v19, %v268_v18  ;;  %v524_v18 = vld [vmem:[#allocation4 + $0x4f8] sm:$0xff] }
  0xc2   :  { %1139 = vmatpush1.bf16.msra.mxu0 %v1138_v23  ;;  %v1180_v23 = vpack.c.bf16 %v281_v21, %v277_v20  ;;  %v1266_v20 = vpack.c.bf16 %v515_v14, %v511_v13  ;;  %v517_v21 = vld [vmem:[#allocation4 + $0x4c0] sm:$0xff]  ;;  %v551_v13 = vld [vmem:[#allocation4 + $0x5d0] sm:$0xff] }
  0xc3   :  { %1141 = vmatprep.subr.bf16.mxu0 %v1140_v24  ;;  %v276_v24 = vld [vmem:[#allocation4 + $0x350] sm:$0xff] }
  0xc4   :  { %v1182_v28 = vpack.c.bf16 %v280_v25, %v276_v24  ;;  %v519_v25 = vld [vmem:[#allocation4 + $0x4d0] sm:$0xff] }
  0xc5   :  { %v555_v14 = vld [vmem:[#allocation4 + $0x5f0] sm:$0xff] }
  0xc6   :  { %1143 = vmatpush1.bf16.msra.mxu0 %v1142_v29  ;;  %v1184_v29 = vpack.c.bf16 %v289_v27, %v285_v26  ;;  %v523_v26 = vld [vmem:[#allocation4 + $0x4f0] sm:$0xff]  ;;  %v526_v27 = vld [vmem:[#allocation4 + $0x508] sm:$0xff] }
  0xc7   :  { %1145 = vmatprep.subr.bf16.mxu0 %v1144_v30  ;;  %v284_v30 = vld [vmem:[#allocation4 + $0x390] sm:$0xff] }
  0xc8   :  { %v1186_v34 = vpack.c.bf16 %v288_v31, %v284_v30  ;;  %v532_v30 = vld [vmem:[#allocation4 + $0x538] sm:$0xff] }
  0xca   :  { %1147 = vmatpush1.bf16.msra.mxu0 %v1146_v35  ;;  %v1188_v35 = vpack.c.bf16 %v297_v33, %v293_v32  ;;  %v1270_v32 = vpack.c.bf16 %v523_v26, %v519_v25  ;;  %v559_v25 = vld [vmem:[#allocation4 + $0x610] sm:$0xff] }
  0xcb   :  { %1149 = vmatprep.subr.bf16.mxu0 %v1148_v36  ;;  %v292_v36 = vld [vmem:[#allocation4 + $0x3d0] sm:$0xff] }
  0xcc   :  { %v1190_v38 = vpack.c.bf16 %v296_v37, %v292_v36  ;;  %v529_v36 = vld [vmem:[#allocation4 + $0x520] sm:$0xff]  ;;  %v527_v37 = vld [vmem:[#allocation4 + $0x510] sm:$0xff] }
  0xcd   :  { %v563_v26 = vld [vmem:[#allocation4 + $0x630] sm:$0xff] }
  0xce   :  { %1151 = vmatpush1.bf16.msra.mxu0 %v1150_v41  ;;  %v498_v41 = vld [vmem:[#allocation4 + $0x428] sm:$0xff] }
  0xcf   :  { %1153 = vmatprep.subr.bf16.mxu0 %v1152_v42  ;;  %v496_v42 = vld [vmem:[#allocation4 + $0x418] sm:$0xff]  ;;  %v1192_v43 = vpack.c.bf16 %v498_v41, %v494_v40  ;;  %v1274_v40 = vpack.c.bf16 %v531_v39, %v527_v37  ;;  %v534_v41 = vld [vmem:[#allocation4 + $0x548] sm:$0xff]  ;;  %v567_v37 = vld [vmem:[#allocation4 + $0x650] sm:$0xff] }
  0xd0   :  { %v1256_v45 = vpack.c.bf16 %v500_v44, %v496_v42  ;;  %v538_v42 = vld [vmem:[#allocation4 + $0x568] sm:$0xff] }
  0xd1   :  { %1193 = vmatprep.subr.bf16.mxu1 %v1192_v43  ;;  %v536_v43 = vld [vmem:[#allocation4 + $0x558] sm:$0xff]  ;;  %v1212_v44 = vpack.c.bf16 %v538_v42, %v534_v41  ;;  %v578_v41 = vld [vmem:[#allocation4 + $0x6a8] sm:$0xff] }
  0xd2   :  { %1155 = vmatpush1.bf16.msra.mxu0 %v1154_v47  ;;  %v497_v47 = vld [vmem:[#allocation4 + $0x420] sm:$0xff]  ;;  %v576_v42 = vld [vmem:[#allocation4 + $0x698] sm:$0xff] }
  0xd3   :  { %1157 = vmatprep.subr.bf16.mxu0 %v1156_v48  ;;  %v495_v48 = vld [vmem:[#allocation4 + $0x410] sm:$0xff] }
  0xd4   :  { %v1258_v55 = vpack.c.bf16 %v499_v49, %v495_v48 }
  0xd6   :  { %1159 = vmatpush1.bf16.msra.mxu0 %v1158_v53  ;;  %v508_v53 = vld [vmem:[#allocation4 + $0x478] sm:$0xff] }
  0xd7   :  { %1161 = vmatprep.subr.bf16.mxu0 %v1160_v54  ;;  %v1194_v54 = vpack.c.bf16 %v497_v47, %v493_v46  ;;  %v533_v46 = vld [vmem:[#allocation4 + $0x540] sm:$0xff] }
  0xd8   :  { %v537_v47 = vld [vmem:[#allocation4 + $0x560] sm:$0xff] }
  0xd9   :  { %v1214_v49 = vpack.c.bf16 %v537_v47, %v533_v46  ;;  %v577_v46 = vld [vmem:[#allocation4 + $0x6a0] sm:$0xff] }
  0xda   :  { %1163 = vmatpush1.bf16.msra.mxu0 %v1162_v59  ;;  %v1260_v59 = vpack.c.bf16 %v508_v53, %v504_v52  ;;  %v1278_v52 = vpack.c.bf16 %v539_v51, %v535_v50  ;;  %v542_v53 = vld [vmem:[#allocation4 + $0x588] sm:$0xff]  ;;  %v579_v50 = vld [vmem:[#allocation4 + $0x6b0] sm:$0xff] }
  0xdb   :  { %1165 = vmatprep.subr.bf16.mxu0 %v1164_v60  ;;  %v503_v60 = vld [vmem:[#allocation4 + $0x450] sm:$0xff] }
  0xdc   :  { %v1262_v7 = vpack.c.bf16 %v507_v61, %v503_v60 }
  0xde   :  { %1167 = vmatpush1.bf16.msra.mxu0 %v1166_v3  ;;  %v512_v3 = vld [vmem:[#allocation4 + $0x498] sm:$0xff] }
  0xdf   :  { %1169 = vmatprep.subr.bf16.mxu0 %v1168_v4  ;;  %v516_v4 = vld [vmem:[#allocation4 + $0x4b8] sm:$0xff] }
  0xe0   :  { %v1264_v12 = vpack.c.bf16 %v516_v4, %v512_v3  ;;  %v550_v3 = vld [vmem:[#allocation4 + $0x5c8] sm:$0xff] }
  0xe1   :  { %v554_v4 = vld [vmem:[#allocation4 + $0x5e8] sm:$0xff] }
  0xe2   :  { %1171 = vmatpush1.bf16.msra.mxu0 %v1170_v10  ;;  %v513_v10 = vld [vmem:[#allocation4 + $0x4a0] sm:$0xff] }
  0xe3   :  { %1173 = vmatprep.subr.bf16.mxu0 %v1172_v11  ;;  %v1200_v11 = vpack.c.bf16 %v514_v0, %v510_v62  ;;  %v1202_v19 = vpack.c.bf16 %v513_v10, %v509_v9  ;;  %v543_v62 = vld [vmem:[#allocation4 + $0x590] sm:$0xff]  ;;  %v549_v9 = vld [vmem:[#allocation4 + $0x5c0] sm:$0xff] }
  0xe4   :  { %v553_v10 = vld [vmem:[#allocation4 + $0x5e0] sm:$0xff] }
  0xe6   :  { %1175 = vmatpush1.bf16.msra.mxu0 %v1174_v16  ;;  %v522_v16 = vld [vmem:[#allocation4 + $0x4e8] sm:$0xff] }
  0xe7   :  { %1177 = vmatprep.subr.bf16.mxu0 %v1176_v17  ;;  %v520_v17 = vld [vmem:[#allocation4 + $0x4d8] sm:$0xff] }
  0xe8   :  { %v1268_v24 = vpack.c.bf16 %v524_v18, %v520_v17  ;;  %v562_v17 = vld [vmem:[#allocation4 + $0x628] sm:$0xff]  ;;  %v560_v18 = vld [vmem:[#allocation4 + $0x618] sm:$0xff] }
  0xea   :  { %1179 = vmatpush1.bf16.msra.mxu0 %v1178_v22  ;;  %v521_v22 = vld [vmem:[#allocation4 + $0x4e0] sm:$0xff] }
  0xeb   :  { %1181 = vmatprep.subr.bf16.mxu0 %v1180_v23  ;;  %v1204_v23 = vpack.c.bf16 %v522_v16, %v518_v15  ;;  %v1206_v31 = vpack.c.bf16 %v521_v22, %v517_v21  ;;  %v1286_v15 = vpack.c.bf16 %v555_v14, %v551_v13  ;;  %v558_v16 = vld [vmem:[#allocation4 + $0x608] sm:$0xff]  ;;  %v557_v21 = vld [vmem:[#allocation4 + $0x600] sm:$0xff] }
  0xec   :  { %v561_v22 = vld [vmem:[#allocation4 + $0x620] sm:$0xff] }
  0xee   :  { %1183 = vmatpush1.bf16.msra.mxu0 %v1182_v28  ;;  %v530_v28 = vld [vmem:[#allocation4 + $0x528] sm:$0xff] }
  0xef   :  { %1185 = vmatprep.subr.bf16.mxu0 %v1184_v29  ;;  %v528_v29 = vld [vmem:[#allocation4 + $0x518] sm:$0xff]  ;;  %v1208_v33 = vpack.c.bf16 %v530_v28, %v526_v27  ;;  %v1290_v27 = vpack.c.bf16 %v563_v26, %v559_v25  ;;  %v566_v28 = vld [vmem:[#allocation4 + $0x648] sm:$0xff]  ;;  %v603_v25 = vld [vmem:[#allocation4 + $0x770] sm:$0xff] }
  0xf0   :  { %v606_v26 = vld [vmem:[#allocation4 + $0x788] sm:$0xff] }
  0xf2   :  { %1187 = vmatpush1.bf16.msra.mxu0 %v1186_v34  ;;  %v1272_v34 = vpack.c.bf16 %v532_v30, %v528_v29  ;;  %v570_v29 = vld [vmem:[#allocation4 + $0x668] sm:$0xff]  ;;  %v568_v30 = vld [vmem:[#allocation4 + $0x658] sm:$0xff] }
  0xf3   :  { %1189 = vmatprep.subr.bf16.mxu0 %v1188_v35  ;;  %v525_v35 = vld [vmem:[#allocation4 + $0x500] sm:$0xff] }
  0xf6   :  { %1191 = vmatpush1.bf16.msra.mxu0 %v1190_v38  ;;  %v1210_v38 = vpack.c.bf16 %v529_v36, %v525_v35 }
  0xf7   :  { %1257 = vmatprep.subr.bf16.mxu0 %v1256_v45  ;;  %v540_v45 = vld [vmem:[#allocation4 + $0x578] sm:$0xff] }
  0xf8   :  { %v1276_v48 = vpack.c.bf16 %v540_v45, %v536_v43  ;;  %v573_v45 = vld [vmem:[#allocation4 + $0x680] sm:$0xff] }
 0x18c   :  { %v164_v63 = vpop.f32.mrb[0].mxu0 }
 0x18d   :  { %v1004_v5 = vpop.f32.mrb[1].mxu0  ;;  %385 = vmatmul.mubr.f32.vlgmr.msra.gmra.mrb[0].mxu1 %v164_v63  ;;  %456 = vmatmul.mubr.f32.vlgmr.msra.gmra.mrb[2].mxu0 %v164_v63  ;;  %v547_v63 = vld [vmem:[#allocation4 + $0x5b0] sm:$0xff] }
 0x18e   :  { %1195 = vmatpush1.bf16.msra.mxu1 %v1194_v54  ;;  %1259 = vmatpush1.bf16.msra.mxu0 %v1258_v55  ;;  %v546_v54 = vld [vmem:[#allocation4 + $0x5a8] sm:$0xff]  ;;  %v544_v55 = vld [vmem:[#allocation4 + $0x598] sm:$0xff]  ;;  %v1282_v0 = vpack.c.bf16 %v547_v63, %v543_v62  ;;  %v587_v62 = vld [vmem:[#allocation4 + $0x6f0] sm:$0xff] }
 0x18f   :  { %1197 = vmatprep.subr.bf16.mxu1 %v1196_v58  ;;  %1261 = vmatprep.subr.bf16.mxu0 %v1260_v59  ;;  %v1216_v56 = vpack.c.bf16 %v546_v54, %v542_v53  ;;  %v541_v58 = vld [vmem:[#allocation4 + $0x580] sm:$0xff]  ;;  %v1280_v60 = vpack.c.bf16 %v548_v57, %v544_v55  ;;  %v552_v5 = vld [vmem:[#allocation4 + $0x5d8] sm:$0xff]  ;;  %v586_v53 = vld [vmem:[#allocation4 + $0x6e8] sm:$0xff] }
 0x190   :  { %v545_v59 = vld [vmem:[#allocation4 + $0x5a0] sm:$0xff]  ;;  %v584_v54 = vld [vmem:[#allocation4 + $0x6d8] sm:$0xff] }
 0x191   :  { %v1218_v61 = vpack.c.bf16 %v545_v59, %v541_v58  ;;  %v581_v57 = vld [vmem:[#allocation4 + $0x6c0] sm:$0xff] }
 0x192   :  { %1199 = vmatpush1.bf16.msra.mxu1 %v1198_v6  ;;  %1263 = vmatpush1.bf16.msra.mxu0 %v1262_v7  ;;  %v1220_v6 = vpack.c.bf16 %v554_v4, %v550_v3  ;;  %v556_v7 = vld [vmem:[#allocation4 + $0x5f8] sm:$0xff]  ;;  %v585_v58 = vld [vmem:[#allocation4 + $0x6e0] sm:$0xff]  ;;  %v594_v3 = vld [vmem:[#allocation4 + $0x728] sm:$0xff] }
 0x193   :  { %1201 = vmatprep.subr.bf16.mxu1 %v1200_v11  ;;  %1265 = vmatprep.subr.bf16.mxu0 %v1264_v12  ;;  %v1284_v11 = vpack.c.bf16 %v556_v7, %v552_v5  ;;  %v1222_v12 = vpack.c.bf16 %v553_v10, %v549_v9  ;;  %v592_v5 = vld [vmem:[#allocation4 + $0x718] sm:$0xff]  ;;  %v589_v7 = vld [vmem:[#allocation4 + $0x700] sm:$0xff] }
 0x194   :  { %v593_v10 = vld [vmem:[#allocation4 + $0x720] sm:$0xff] }
 0x195   :  { %v1242_v13 = vpack.c.bf16 %v593_v10, %v589_v7 }
 0x196   :  { %1203 = vmatpush1.bf16.msra.mxu1 %v1202_v19  ;;  %1267 = vmatpush1.bf16.msra.mxu0 %v1266_v20  ;;  %v1224_v19 = vpack.c.bf16 %v562_v17, %v558_v16  ;;  %v564_v20 = vld [vmem:[#allocation4 + $0x638] sm:$0xff]  ;;  %v602_v16 = vld [vmem:[#allocation4 + $0x768] sm:$0xff] }
 0x197   :  { %1205 = vmatprep.subr.bf16.mxu1 %v1204_v23  ;;  %1269 = vmatprep.subr.bf16.mxu0 %v1268_v24  ;;  %v1288_v23 = vpack.c.bf16 %v564_v20, %v560_v18  ;;  %v1226_v24 = vpack.c.bf16 %v561_v22, %v557_v21  ;;  %v600_v17 = vld [vmem:[#allocation4 + $0x758] sm:$0xff]  ;;  %v597_v20 = vld [vmem:[#allocation4 + $0x740] sm:$0xff] }
 0x198   :  { %v601_v21 = vld [vmem:[#allocation4 + $0x760] sm:$0xff] }
 0x19a   :  { %1207 = vmatpush1.bf16.msra.mxu1 %v1206_v31  ;;  %1271 = vmatpush1.bf16.msra.mxu0 %v1270_v32  ;;  %v1228_v31 = vpack.c.bf16 %v570_v29, %v566_v28  ;;  %v572_v32 = vld [vmem:[#allocation4 + $0x678] sm:$0xff]  ;;  %v610_v28 = vld [vmem:[#allocation4 + $0x7a8] sm:$0xff] }
 0x19b   :  { %1209 = vmatprep.subr.bf16.mxu1 %v1208_v33  ;;  %1273 = vmatprep.subr.bf16.mxu0 %v1272_v34  ;;  %v565_v33 = vld [vmem:[#allocation4 + $0x640] sm:$0xff]  ;;  %v1292_v35 = vpack.c.bf16 %v572_v32, %v568_v30  ;;  %v608_v29 = vld [vmem:[#allocation4 + $0x798] sm:$0xff] }
 0x19c   :  { %v569_v34 = vld [vmem:[#allocation4 + $0x660] sm:$0xff]  ;;  %v612_v30 = vld [vmem:[#allocation4 + $0x7b8] sm:$0xff] }
 0x19d   :  { %v1230_v36 = vpack.c.bf16 %v569_v34, %v565_v33  ;;  %v1312_v32 = vpack.c.bf16 %v612_v30, %v608_v29  ;;  %v605_v33 = vld [vmem:[#allocation4 + $0x780] sm:$0xff]  ;;  %v816_v30 = vld [vmem:[#allocation6 + $0x10] sm:$0xff] }
 0x19e   :  { %1211 = vmatpush1.bf16.msra.mxu1 %v1210_v38  ;;  %1275 = vmatpush1.bf16.msra.mxu0 %v1274_v40  ;;  %v571_v38 = vld [vmem:[#allocation4 + $0x670] sm:$0xff]  ;;  %v574_v40 = vld [vmem:[#allocation4 + $0x688] sm:$0xff]  ;;  %v609_v34 = vld [vmem:[#allocation4 + $0x7a0] sm:$0xff] }
 0x19f   :  { %1213 = vmatprep.subr.bf16.mxu1 %v1212_v44  ;;  %1277 = vmatprep.subr.bf16.mxu0 %v1276_v48  ;;  %v1294_v39 = vpack.c.bf16 %v571_v38, %v567_v37  ;;  %v1232_v43 = vpack.c.bf16 %v578_v41, %v574_v40  ;;  %v580_v44 = vld [vmem:[#allocation4 + $0x6b8] sm:$0xff]  ;;  %v1234_v48 = vpack.c.bf16 %v577_v46, %v573_v45  ;;  %v611_v37 = vld [vmem:[#allocation4 + $0x7b0] sm:$0xff]  ;;  %v614_v38 = vld [vmem:[#allocation4 + $0x7c8] sm:$0xff] }
 0x1a0   :  { %v1296_v47 = vpack.c.bf16 %v580_v44, %v576_v42  ;;  %v616_v42 = vld [vmem:[#allocation4 + $0x7d8] sm:$0xff]  ;;  %v613_v44 = vld [vmem:[#allocation4 + $0x7c0] sm:$0xff] }
 0x1a1   :  { %v617_v46 = vld [vmem:[#allocation4 + $0x7e0] sm:$0xff] }
 0x1a2   :  { %1215 = vmatpush1.bf16.msra.mxu1 %v1214_v49  ;;  %1279 = vmatpush1.bf16.msra.mxu0 %v1278_v52  ;;  %v575_v49 = vld [vmem:[#allocation4 + $0x690] sm:$0xff]  ;;  %v582_v52 = vld [vmem:[#allocation4 + $0x6c8] sm:$0xff] }
 0x1a3   :  { %1217 = vmatprep.subr.bf16.mxu1 %v1216_v56  ;;  %1281 = vmatprep.subr.bf16.mxu0 %v1280_v60  ;;  %v1298_v51 = vpack.c.bf16 %v579_v50, %v575_v49  ;;  %v1236_v55 = vpack.c.bf16 %v586_v53, %v582_v52  ;;  %v588_v56 = vld [vmem:[#allocation4 + $0x6f8] sm:$0xff]  ;;  %v1238_v60 = vpack.c.bf16 %v585_v58, %v581_v57  ;;  %v927_v49 = vld [vmem:[%s1647_s2 + $0x8] sm:$0xff]  ;;  %v1584_v52 = vshrl.u32 %v74_v2, 7 }
 0x1a4   :  { %v1300_v59 = vpack.c.bf16 %v588_v56, %v584_v54  ;;  %v1254_v50 = vpack.c.bf16 %v617_v46, %v613_v44  ;;  %708 = vmatprep.mubr.f32.mxu1 %v927_v49  ;;  %779 = vmatprep.mubr.f32.mxu0 %v927_v49  ;;  %v298_v54 = vld [vmem:[%s1650_s5] sm:$0xf] }
 0x1a5   :  { %v302_v53 = vsub.s32 0, %v1584_v52 }
 0x1a6   :  { %1219 = vmatpush1.bf16.msra.mxu1 %v1218_v61  ;;  %1283 = vmatpush1.bf16.msra.mxu0 %v1282_v0  ;;  %v583_v61 = vld [vmem:[#allocation4 + $0x6d0] sm:$0xff]  ;;  %v590_v0 = vld [vmem:[#allocation4 + $0x708] sm:$0xff] }
 0x1a7   :  { %1221 = vmatprep.subr.bf16.mxu1 %v1220_v6  ;;  %1285 = vmatprep.subr.bf16.mxu0 %v1284_v11  ;;  %v1302_v63 = vpack.c.bf16 %v587_v62, %v583_v61  ;;  %v1240_v4 = vpack.c.bf16 %v594_v3, %v590_v0  ;;  %v596_v6 = vld [vmem:[#allocation4 + $0x738] sm:$0xff]  ;;  %v591_v11 = vld [vmem:[#allocation4 + $0x710] sm:$0xff]  ;;  %v303_v56 = vrot.slane %v298_v54, %v302_v53 }
 0x1a8   :  { %v1304_v9 = vpack.c.bf16 %v596_v6, %v592_v5  ;;  %v310_v5 = vsub.s32 2, %v1584_v52 }
 0x1aa   :  { %1223 = vmatpush1.bf16.msra.mxu1 %v1222_v12  ;;  %1287 = vmatpush1.bf16.msra.mxu0 %v1286_v15  ;;  %v595_v12 = vld [vmem:[#allocation4 + $0x730] sm:$0xff]  ;;  %v598_v15 = vld [vmem:[#allocation4 + $0x748] sm:$0xff]  ;;  %v311_v7 = vrot.slane %v298_v54, %v310_v5 }
 0x1ab   :  { %1225 = vmatprep.subr.bf16.mxu1 %v1224_v19  ;;  %1289 = vmatprep.subr.bf16.mxu0 %v1288_v23  ;;  %v1306_v14 = vpack.c.bf16 %v595_v12, %v591_v11  ;;  %v1244_v18 = vpack.c.bf16 %v602_v16, %v598_v15  ;;  %v604_v19 = vld [vmem:[#allocation4 + $0x778] sm:$0xff]  ;;  %v1246_v23 = vpack.c.bf16 %v601_v21, %v597_v20 }
 0x1ac   :  { %v1308_v22 = vpack.c.bf16 %v604_v19, %v600_v17  ;;  %v169_v17 = vld [vmem:[%s1648_s3] sm:$0xff] }
 0x1ae   :  { %1227 = vmatpush1.bf16.msra.mxu1 %v1226_v24  ;;  %1291 = vmatpush1.bf16.msra.mxu0 %v1290_v27  ;;  %v599_v24 = vld [vmem:[#allocation4 + $0x750] sm:$0xff] }
 0x1af   :  { %1229 = vmatprep.subr.bf16.mxu1 %v1228_v31  ;;  %1293 = vmatprep.subr.bf16.mxu0 %v1292_v35  ;;  %v1310_v27 = vpack.c.bf16 %v603_v25, %v599_v24  ;;  %v1248_v31 = vpack.c.bf16 %v610_v28, %v606_v26  ;;  %v607_v35 = vld [vmem:[#allocation4 + $0x790] sm:$0xff]  ;;  %v815_v28 = vld [vmem:[#allocation6 + $0x8] sm:$0xff] }
 0x1b0   :  { %v1314_v40 = vpack.c.bf16 %v611_v37, %v607_v35 }
 0x1b2   :  { %1231 = vmatpush1.bf16.msra.mxu1 %v1230_v36  ;;  %1295 = vmatpush1.bf16.msra.mxu0 %v1294_v39  ;;  %v1250_v36 = vpack.c.bf16 %v609_v34, %v605_v33  ;;  %v618_v39 = vld [vmem:[#allocation4 + $0x7e8] sm:$0xff]  ;;  %v818_v33 = vld [vmem:[#allocation6 + $0x20] sm:$0xff] }
 0x1b3   :  { %1233 = vmatprep.subr.bf16.mxu1 %v1232_v43  ;;  %1297 = vmatprep.subr.bf16.mxu0 %v1296_v47  ;;  %v1252_v41 = vpack.c.bf16 %v618_v39, %v614_v38  ;;  %v620_v43 = vld [vmem:[#allocation4 + $0x7f8] sm:$0xff]  ;;  %v615_v47 = vld [vmem:[#allocation4 + $0x7d0] sm:$0xff]  ;;  %v819_v34 = vld [vmem:[#allocation6 + $0x28] sm:$0xff] }
 0x1b4   :  { %v1316_v45 = vpack.c.bf16 %v620_v43, %v616_v42  ;;  %v1327_v35 = vpack.c.bf16 %v819_v34, %v818_v33  ;;  %v822_v38 = vld [vmem:[#allocation6 + $0x40] sm:$0xff]  ;;  %v823_v39 = vld [vmem:[#allocation6 + $0x48] sm:$0xff]  ;;  %v825_v42 = vld [vmem:[#allocation6 + $0x58] sm:$0xff] }
 0x1b5   :  { %v826_v43 = vld [vmem:[#allocation6 + $0x60] sm:$0xff] }
 0x1b6   :  { %1235 = vmatpush1.bf16.msra.mxu1 %v1234_v48  ;;  %1299 = vmatpush1.bf16.msra.mxu0 %v1298_v51  ;;  %v619_v48 = vld [vmem:[#allocation4 + $0x7f0] sm:$0xff] }
 0x1b7   :  { %1237 = vmatprep.subr.bf16.mxu1 %v1236_v55  ;;  %1301 = vmatprep.subr.bf16.mxu0 %v1300_v59  ;;  %v1318_v51 = vpack.c.bf16 %v619_v48, %v615_v47  ;;  %v306_v55 = vsub.s32 1, %v1584_v52  ;;  %v828_v47 = vld [vmem:[#allocation6 + $0x70] sm:$0xff]  ;;  %v829_v48 = vld [vmem:[#allocation6 + $0x78] sm:$0xff] }
 0x1b8   :  { %v1342_v49 = vpack.c.bf16 %v829_v48, %v828_v47 }
 0x1b9   :  { %v307_v57 = vrot.slane %v298_v54, %v306_v55 }
 0x1ba   :  { %1239 = vmatpush1.bf16.msra.mxu1 %v1238_v60  ;;  %1303 = vmatpush1.bf16.msra.mxu0 %v1302_v63  ;;  %v314_v60 = vsub.s32 3, %v1584_v52 }
 0x1bb   :  { %1241 = vmatprep.subr.bf16.mxu1 %v1240_v4  ;;  %1305 = vmatprep.subr.bf16.mxu0 %v1304_v9 }
 0x1bc   :  { %v315_v4 = vrot.slane %v298_v54, %v314_v60 }
 0x1be   :  { %1243 = vmatpush1.bf16.msra.mxu1 %v1242_v13  ;;  %1307 = vmatpush1.bf16.msra.mxu0 %v1306_v14 }
 0x1bf   :  { %1245 = vmatprep.subr.bf16.mxu1 %v1244_v18  ;;  %1309 = vmatprep.subr.bf16.mxu0 %v1308_v22 }
 0x1c2   :  { %1247 = vmatpush1.bf16.msra.mxu1 %v1246_v23  ;;  %1311 = vmatpush1.bf16.msra.mxu0 %v1310_v27  ;;  %v814_v27 = vld [vmem:[#allocation6] sm:$0xff] }
 0x1c3   :  { %1249 = vmatprep.subr.bf16.mxu1 %v1248_v31  ;;  %1313 = vmatprep.subr.bf16.mxu0 %v1312_v32  ;;  %v1321_v29 = vpack.c.bf16 %v815_v28, %v814_v27  ;;  %v817_v31 = vld [vmem:[#allocation6 + $0x18] sm:$0xff] }
 0x1c4   :  { %v1324_v32 = vpack.c.bf16 %v817_v31, %v816_v30 }
 0x1c6   :  { %1251 = vmatpush1.bf16.msra.mxu1 %v1250_v36  ;;  %1315 = vmatpush1.bf16.msra.mxu0 %v1314_v40  ;;  %v820_v36 = vld [vmem:[#allocation6 + $0x30] sm:$0xff]  ;;  %v1333_v40 = vpack.c.bf16 %v823_v39, %v822_v38 }
 0x1c7   :  { %1253 = vmatprep.subr.bf16.mxu1 %v1252_v41  ;;  %1317 = vmatprep.subr.bf16.mxu0 %v1316_v45  ;;  %v824_v41 = vld [vmem:[#allocation6 + $0x50] sm:$0xff]  ;;  %v827_v45 = vld [vmem:[#allocation6 + $0x68] sm:$0xff] }
 0x1c8   :  { %v1336_v44 = vpack.c.bf16 %v825_v42, %v824_v41  ;;  %v1339_v46 = vpack.c.bf16 %v827_v45, %v826_v43 }
 0x1ca   :  { %1255 = vmatpush1.bf16.msra.mxu1 %v1254_v50  ;;  %1319 = vmatpush1.bf16.msra.mxu0 %v1318_v51  ;;  %v929_v50 = vld [vmem:[%s1650_s5 + $0x4] sm:$0xf] }
 0x1cb   :  { %1320 = vmatprep.subr.bf16.mxu1 %v1467_v1  ;;  %v627_v51 = vrot.slane %v929_v50, %v302_v53  ;;  %v631_v54 = vrot.slane %v929_v50, %v306_v55  ;;  %v635_v53 = vrot.slane %v929_v50, %v310_v5 }
 0x260   :  { %v386_v58 = vpop.f32.mrb[0].mxu1  ;;  %v457_v59 = vpop.f32.mrb[2].mxu0 }
 0x261   :  { %v387_v2 = vadd.f32 %v386_v58, %v303_v56  ;;  %v388_v61 = vpop.f32.mrb[1].mxu1  ;;  %v459_v62 = vpop.f32.mrb[3].mxu0  ;;  %v458_v10 = vadd.f32 %v457_v59, %v311_v7 }
 0x262   :  { %v389_v63 = vadd.f32 %v388_v61, %v307_v57  ;;  %v460_v6 = vadd.f32 %v459_v62, %v315_v4 }
 0x263   :  { %v924_v0 = vmul.f32 -1.442695, %v387_v2 }
 0x264   :  { %v925_v3 = vmul.f32 -1.442695, %v389_v63  ;;  %v926_v9 = vmul.f32 -1.442695, %v460_v6 }
 0x265   :  { %1357 = vpow2.f32 %v924_v0 }
 0x266   :  { %1359 = vpow2.f32 %v925_v3 }
 0x267   :  { %1361 = vpow2.f32 %v926_v9 }
 0x268   :  { %1363 = vtanh.f32 %v458_v10 }
 0x26f   :  { %v1358_v11 = vpop.eup %1357 }
 0x270   :  { %v1360_v12 = vpop.eup %1359  ;;  %v465_v13 = vadd.f32 1.0, %v1358_v11 }
 0x271   :  { %v471_v14 = vadd.f32 1.0, %v1360_v12  ;;  %v1362_v15 = vpop.eup %1361 }
 0x272   :  { %1365 = vrcp.f32 %v465_v13  ;;  %v1364_v16 = vpop.eup %1363  ;;  %v478_v21 = vadd.f32 1.0, %v1362_v15 }
 0x273   :  { %1367 = vrcp.f32 %v471_v14 }
 0x274   :  { %1369 = vrcp.f32 %v478_v21 }
 0x27c   :  { %v1366_v18 = vpop.eup %1365 }
 0x27d   :  { %v1368_v19 = vpop.eup %1367  ;;  %v482_v20 = vmul.f32 %v1366_v18, %v1364_v16 }
 0x27e   :  { %v481_v22 = vmul.f32 %v1368_v19, %v169_v17  ;;  %v1370_v24 = vpop.eup %1369  ;;  %v935_v19 = vld [vmem:[%s1652_s7] ss:$0 sm:$0xff] }
 0x280   :  { %v483_v23 = vadd.f32 %v482_v20, %v481_v22 }
 0x282   :  { %487 = vst [vmem:[%s1655_s10] sm:$0xff] %v483_v23  ;;  %1371 = vtanh.f32 %v483_v23 }
 0x28c   :  { %v1372_v25 = vpop.eup %1371 }
 0x28d   :  { %v485_v26 = vmul.f32 %v1372_v25, %v1370_v24 }
 0x28f   :  { %486 = vst [vmem:[%s1654_s9] sm:$0xff] %v485_v26  ;;  %709 = vmatmul.mubr.f32.vlgmr.msra.gmra.mrb[2].mxu1 %v485_v26  ;;  %780 = vmatmul.mubr.f32.vlgmr.msra.gmra.mrb[4].mxu0 %v485_v26 }
 0x290   :  { %1037 = vmatprep.mubr.msk.f32.mxu1 %vm1468_vm0, %v1469_v8  ;;  %1322 = vmatpush3.bf16.msra.mxu1 %v1321_v29  ;;  %v821_v8 = vld [vmem:[#allocation6 + $0x38] sm:$0xff] }
 0x291   :  { %1323 = vmatprep.subr.bf16.mxu1 %v1467_v1  ;;  %v1330_v37 = vpack.c.bf16 %v821_v8, %v820_v36 }
 0x294   :  { %1325 = vmatpush3.bf16.msra.mxu1 %v1324_v32 }
 0x295   :  { %1326 = vmatprep.subr.bf16.mxu1 %v1467_v1 }
 0x298   :  { %1328 = vmatpush3.bf16.msra.mxu1 %v1327_v35 }
 0x299   :  { %1329 = vmatprep.subr.bf16.mxu1 %v1467_v1 }
 0x29c   :  { %1331 = vmatpush3.bf16.msra.mxu1 %v1330_v37 }
 0x29d   :  { %1332 = vmatprep.subr.bf16.mxu1 %v1467_v1 }
 0x2a0   :  { %1334 = vmatpush3.bf16.msra.mxu1 %v1333_v40 }
 0x2a1   :  { %1335 = vmatprep.subr.bf16.mxu1 %v1467_v1 }
 0x2a4   :  { %1337 = vmatpush3.bf16.msra.mxu1 %v1336_v44 }
 0x2a5   :  { %1338 = vmatprep.subr.bf16.mxu1 %v1467_v1 }
 0x2a8   :  { %1340 = vmatpush3.bf16.msra.mxu1 %v1339_v46 }
 0x2a9   :  { %1341 = vmatprep.subr.bf16.mxu1 %v1467_v1  ;;  %v639_v1 = vrot.slane %v929_v50, %v314_v60  ;;  %v928_v60 = vld [vmem:[%s1648_s3 + $0x8] sm:$0xff] }
 0x2ac   :  { %1343 = vmatpush3.bf16.msra.mxu1 %v1342_v49 }
 0x362   :  { %v710_v56 = vpop.f32.mrb[2].mxu1  ;;  %v781_v57 = vpop.f32.mrb[4].mxu0 }
 0x363   :  { %v711_v58 = vadd.f32 %v710_v56, %v627_v51  ;;  %v712_v59 = vpop.f32.mrb[3].mxu1  ;;  %v783_v2 = vpop.f32.mrb[5].mxu0  ;;  %v782_v4 = vadd.f32 %v781_v57, %v635_v53 }
 0x364   :  { %v713_v61 = vadd.f32 %v712_v59, %v631_v54  ;;  %v784_v0 = vadd.f32 %v783_v2, %v639_v1 }
 0x365   :  { %v930_v62 = vmul.f32 -1.442695, %v711_v58 }
 0x366   :  { %v931_v63 = vmul.f32 -1.442695, %v713_v61  ;;  %v932_v3 = vmul.f32 -1.442695, %v784_v0 }
 0x367   :  { %1373 = vpow2.f32 %v930_v62 }
 0x368   :  { %1375 = vpow2.f32 %v931_v63 }
 0x369   :  { %1377 = vpow2.f32 %v932_v3 }
 0x36a   :  { %1379 = vtanh.f32 %v782_v4 }
 0x371   :  { %v1374_v55 = vpop.eup %1373 }
 0x372   :  { %v1376_v6 = vpop.eup %1375  ;;  %v789_v7 = vadd.f32 1.0, %v1374_v55 }
 0x373   :  { %v795_v9 = vadd.f32 1.0, %v1376_v6  ;;  %v1378_v10 = vpop.eup %1377 }
 0x374   :  { %1381 = vrcp.f32 %v789_v7  ;;  %v1380_v11 = vpop.eup %1379  ;;  %v802_v5 = vadd.f32 1.0, %v1378_v10 }
 0x375   :  { %1383 = vrcp.f32 %v795_v9 }
 0x376   :  { %1385 = vrcp.f32 %v802_v5 }
 0x37e   :  { %v1382_v12 = vpop.eup %1381 }
 0x37f   :  { %v1384_v13 = vpop.eup %1383  ;;  %v806_v52 = vmul.f32 %v1382_v12, %v1380_v11 }
 0x380   :  { %v805_v14 = vmul.f32 %v1384_v13, %v928_v60  ;;  %v1386_v16 = vpop.eup %1385 }
 0x382   :  { %v807_v15 = vadd.f32 %v806_v52, %v805_v14 }
 0x384   :  { %934 = vst [vmem:[%s1655_s10 + $0x8] sm:$0xff] %v807_v15  ;;  %1387 = vtanh.f32 %v807_v15 }
 0x38e   :  { %v1388_v17 = vpop.eup %1387 }
 0x38f   :  { %v809_v18 = vmul.f32 %v1388_v17, %v1386_v16 }
 0x391   :  { %933 = vst [vmem:[%s1654_s9 + $0x8] sm:$0xff] %v809_v18  ;;  %1038 = vmatmul.mubr.f32.vlgmr.msra.gmra.mrb[4].mxu1 %v809_v18 }
 0x464   :  { %v903_v20 = vpop.f32.mrb[4].mxu1 }
 0x465   :  { %v904_v21 = vadd.f32 %v935_v19, %v903_v20  ;;  %v1039_v22 = vpop.f32.mrb[5].mxu1 }
 0x467   :  { %907 = vst [vmem:[%s1653_s8] sm:$0xff] %v904_v21 }
 0x468   :  { %920 = vsyncpa [#allocation3], 1 }
 0x469   :  { %921 = vsyncpa [#allocation5], 1 }

</bundles_post_ra>
